<compile_context>
chip_gen: v7x
topology: tpu7x:2x2x1
jax: 0.10.0
libtpu: 0.0.40
codegen_flags: <defaults>
</compile_context>

<pallas_src>
import functools

import jax
import jax.numpy as jnp
from jax.experimental import pallas as pl
from jax.experimental.pallas import tpu as pltpu

# MXU input dtype for the MLP matmuls (accumulation stays f32 via
# preferred_element_type). Set to jnp.float32 for exact PyTorch numerics.
MLP_DTYPE = jnp.bfloat16


# ---------------------------------------------------------------------------
# Kernel
# ---------------------------------------------------------------------------

def _run_mlp(blocks, first_ws, first_b, rest, *, act_final=False):
    """MLP(concat(blocks, -1)) with the concat eliminated via per-block dots.

    `first_ws[i]` is the row-block of the first-layer weight matching blocks[i].
    ReLU after every layer except the last (unless act_final=True), matching
    the PyTorch MLP with act_final=False semantics.
    """
    total = 1 + len(rest)
    h = first_b[...]
    for x, w in zip(blocks, first_ws):
        wv = w[...]
        h = h + jnp.dot(x.astype(wv.dtype), wv, preferred_element_type=jnp.float32)
    if total > 1 or act_final:
        h = jnp.maximum(h, 0.0)
    for i, (w, b) in enumerate(rest):
        wv = w[...]
        h = jnp.dot(h.astype(wv.dtype), wv, preferred_element_type=jnp.float32) + b[...]
        if (i + 2 < total) or act_final:
            h = jnp.maximum(h, 0.0)
    return h


def _neurosat_kernel(*refs, n_c, n_l, n_v, num_vars):
    """One grid step = one message-passing round; last step also does readout."""
    it = iter(refs)
    g_ref = next(it)            # (num_clauses, num_lits) f32
    gt_ref = next(it)           # (num_lits, num_clauses) f32
    l0_ref = next(it)           # (num_lits, d) f32 — initial literal embeddings
    c0_ref = next(it)           # (num_clauses, d) f32 — initial clause embeddings

    def take_first(n_blocks):
        ws = [next(it) for _ in range(n_blocks)]
        return ws, next(it)

    def take_pairs(n):
        return [(next(it), next(it)) for _ in range(n)]

    c_first_w, c_first_b = take_first(2)          # [C, lc] blocks
    c_rest = take_pairs(n_c - 1)
    l_first_w, l_first_b = take_first(3)          # [L, cl, flip(L)] blocks
    l_rest = take_pairs(n_l - 1)
    v_first_w, v_first_b = take_first(2)          # [L_pos, L_neg] blocks
    v_mid = take_pairs(n_v - 2)
    v_last_w = next(it)                           # (1, d) f32, pre-transposed
    v_last_b = next(it)                           # (1, 1) f32

    out_ref = next(it)                            # (num_vars, 1) f32
    l_state = next(it)                            # VMEM scratch (num_lits, d) f32
    c_state = next(it)                            # VMEM scratch (num_clauses, d) f32

    r = pl.program_id(0)

    @pl.when(r == 0)
    def _init():
        l_state[...] = l0_ref[...]
        c_state[...] = c0_ref[...]

    L = l_state[...]
    C = c_state[...]

    # literal -> clause messages (f32; lc_scale is folded into the message
    # row-block of the first C-MLP layer at parameter-prep time).
    lc = jnp.dot(g_ref[...], L, preferred_element_type=jnp.float32)

    # clause update: C = C-MLP([C, lc])
    C_new = _run_mlp([C, lc], c_first_w, c_first_b, c_rest)

    # clause -> literal messages: G^T @ C (G^T precomputed in the wrapper,
    # so the contraction stays lane-aligned with no in-kernel transpose).
    cl = jnp.dot(gt_ref[...], C_new, preferred_element_type=jnp.float32)

    # flip(L): swap positive/negative literal halves — sublane rotate on the XLU.
    L_flip = pltpu.roll(L, shift=num_vars, axis=0)

    # literal update: L = L-MLP([L, cl, flip(L)])
    L_new = _run_mlp([L, cl, L_flip], l_first_w, l_first_b, l_rest)

    l_state[...] = L_new
    c_state[...] = C_new

    # Final variable readout, only on the last round.
    @pl.when(r == pl.num_programs(0) - 1)
    def _readout():
        v_pos = L_new[:num_vars]
        v_neg = L_new[num_vars:]
        h = _run_mlp([v_pos, v_neg], v_first_w, v_first_b, v_mid, act_final=True)
        # Last V layer has out_dim == 1: VPU row-reduction instead of an N=1 matmul.
        scores = jnp.sum(h * v_last_w[...], axis=-1, keepdims=True) + v_last_b[...]
        out_ref[...] = scores.astype(out_ref.dtype)


# ---------------------------------------------------------------------------
# pallas_call wrapper
# ---------------------------------------------------------------------------

def _const_spec(arr):
    nd = arr.ndim
    return pl.BlockSpec(tuple(arr.shape), lambda r, _nd=nd: (0,) * _nd)


def _round_spec(arr):
    nd = arr.ndim
    return pl.BlockSpec((None,) + tuple(arr.shape[1:]),
                        lambda r, _nd=nd: (r,) + (0,) * (_nd - 1))


def neurosat_forward(G, prepped):
    num_clauses, num_lits = G.shape
    num_vars = num_lits // 2

    c_blocks, c_first_b, c_rest = prepped["c_mlp"]
    l_blocks, l_first_b, l_rest = prepped["l_mlp"]
    v_blocks, v_first_b, v_mid, (v_last_w, v_last_b) = prepped["v_mlp"]

    num_rounds = c_first_b.shape[0]
    d = c_blocks[0].shape[1]
    n_c = 1 + len(c_rest)
    n_l = 1 + len(l_rest)
    n_v = 2 + len(v_mid)

    Gf = G.astype(jnp.float32)
    Gt = Gf.T                                   # once per call; 0/1 matrix, cheap
    L0 = jnp.full((num_lits, d), prepped["l_init_scale"], jnp.float32)
    C0 = jnp.full((num_clauses, d), prepped["c_init_scale"], jnp.float32)

    flat = [Gf, Gt, L0, C0]
    specs = [_const_spec(Gf), _const_spec(Gt), _const_spec(L0), _const_spec(C0)]

    def add_stacked(blocks, first_b, rest):
        for w in blocks:
            flat.append(w); specs.append(_round_spec(w))
        flat.append(first_b); specs.append(_round_spec(first_b))
        for w, b in rest:
            flat.append(w); specs.append(_round_spec(w))
            flat.append(b); specs.append(_round_spec(b))

    add_stacked(c_blocks, c_first_b, c_rest)
    add_stacked(l_blocks, l_first_b, l_rest)

    for w in v_blocks:
        flat.append(w); specs.append(_const_spec(w))
    flat.append(v_first_b); specs.append(_const_spec(v_first_b))
    for w, b in v_mid:
        flat.append(w); specs.append(_const_spec(w))
        flat.append(b); specs.append(_const_spec(b))
    flat += [v_last_w, v_last_b]
    specs += [_const_spec(v_last_w), _const_spec(v_last_b)]

    kernel = functools.partial(_neurosat_kernel, n_c=n_c, n_l=n_l, n_v=n_v,
                               num_vars=num_vars)

    scores = pl.pallas_call(
        kernel,
        out_shape=jax.ShapeDtypeStruct((num_vars, 1), jnp.float32),
        grid=(num_rounds,),
        in_specs=specs,
        out_specs=pl.BlockSpec((num_vars, 1), lambda r: (0, 0)),
        scratch_shapes=[pltpu.VMEM((num_lits, d), jnp.float32),
                        pltpu.VMEM((num_clauses, d), jnp.float32)],
        compiler_params=pltpu.CompilerParams(
            dimension_semantics=("arbitrary",)),   # rounds are sequential (carry)
    )(*flat)
    return jnp.squeeze(scores, axis=-1)            # (num_vars,)


# ---------------------------------------------------------------------------
# Parameter preparation (runs ONCE, outside the jitted forward)
# ---------------------------------------------------------------------------

def prepare_params(params, *, d):
    """Stack per-round weights, fold lc/cl scales into the message row-block of
    the first-layer weights, cast weights to MLP_DTYPE, reshape biases."""
    lc_scale = jnp.asarray(params["lc_scale"], jnp.float32)
    cl_scale = jnp.asarray(params["cl_scale"], jnp.float32)

    def prep_b(b):
        return b.reshape(1, -1).astype(jnp.float32)

    def stack_rounds(mlps, msg_scale):
        n_layers = len(mlps[0])
        first_in = mlps[0][0][0].shape[0]
        n_blocks = first_in // d
        assert first_in == n_blocks * d
        assert mlps[0][-1][0].shape[1] == d      # last layer must emit d features
        blocks = []
        for blk in range(n_blocks):
            ws = []
            for layers in mlps:
                w = layers[0][0].astype(jnp.float32)[blk * d:(blk + 1) * d]
                if blk == 1:                      # message block of the concat
                    w = w * msg_scale
                ws.append(w.astype(MLP_DTYPE))
            blocks.append(jnp.stack(ws))          # (R, d, out0)
        first_b = jnp.stack([prep_b(layers[0][1]) for layers in mlps])
        rest = []
        for i in range(1, n_layers):
            ws = jnp.stack([layers[i][0].astype(MLP_DTYPE) for layers in mlps])
            bs = jnp.stack([prep_b(layers[i][1]) for layers in mlps])
            rest.append((ws, bs))
        return (blocks, first_b, rest)

    def prep_v(layers):
        assert len(layers) >= 2 and layers[-1][0].shape[1] == 1
        w0, b0 = layers[0]
        n_blocks = w0.shape[0] // d
        blocks = [w0.astype(jnp.float32)[blk * d:(blk + 1) * d].astype(MLP_DTYPE)
                  for blk in range(n_blocks)]
        fb = prep_b(b0)
        mid = [(w.astype(MLP_DTYPE), prep_b(b)) for (w, b) in layers[1:-1]]
        wl, bl = layers[-1]
        last = (wl.astype(jnp.float32).T,          # (1, d) for the VPU reduction
                bl.reshape(1, 1).astype(jnp.float32))
        return (blocks, fb, mid, last)

    return {
        "c_mlp": stack_rounds(params["c_mlps"], lc_scale),
        "l_mlp": stack_rounds(params["l_mlps"], cl_scale),
        "v_mlp": prep_v(params["v_mlp"]),
        "l_init_scale": jnp.asarray(params["l_init_scale"], jnp.float32),
        "c_init_scale": jnp.asarray(params["c_init_scale"], jnp.float32),
    }


# ---------------------------------------------------------------------------
# Deterministic parameter initialization (mimics nn.Linear shapes/init)
# ---------------------------------------------------------------------------

def init_mlp(key, in_features, hidden_layers):
    layers = []
    d_in = in_features
    for d_out in hidden_layers:
        key, kw, kb = jax.random.split(key, 3)
        bound = 1.0 / jnp.sqrt(jnp.float32(d_in))
        # nn.Linear weight is (out, in); we store its transpose (in, out).
        w = jax.random.uniform(kw, (d_in, d_out), jnp.float32, -bound, bound)
        b = jax.random.uniform(kb, (d_out,), jnp.float32, -bound, bound)
        layers.append((w, b))
        d_in = d_out
    return key, layers


def init_params(key, d, num_rounds, c_arch, l_arch, v_arch, lc_scale, cl_scale):
    c_mlps, l_mlps = [], []
    for _ in range(num_rounds):
        key, c_layers = init_mlp(key, 2 * d, c_arch)
        c_mlps.append(c_layers)
        key, l_layers = init_mlp(key, 3 * d, l_arch)
        l_mlps.append(l_layers)
    key, v_layers = init_mlp(key, 2 * d, v_arch)
    return {
        "c_mlps": c_mlps,
        "l_mlps": l_mlps,
        "v_mlp": v_layers,
        "c_init_scale": jnp.float32(1.0 / jnp.sqrt(jnp.float32(d))),
        "l_init_scale": jnp.float32(1.0 / jnp.sqrt(jnp.float32(d))),
        "lc_scale": jnp.float32(lc_scale),
        "cl_scale": jnp.float32(cl_scale),
    }


# ---------------------------------------------------------------------------
# Main
# ---------------------------------------------------------------------------

if __name__ == "__main__":
    key = jax.random.PRNGKey(0)

    # Module-default embedding dim (lane/MXU aligned), small problem size.
    embedding_dim = 128
    num_rounds = 4
    num_vars = 16
    num_lits = 2 * num_vars          # 32
    num_clauses = 32

    c_arch = [embedding_dim, embedding_dim]
    l_arch = [embedding_dim, embedding_dim]
    v_arch = [embedding_dim, embedding_dim, embedding_dim, 1]

    key, kp, kg = jax.random.split(key, 3)
    params = init_params(kp, embedding_dim, num_rounds,
                         c_arch, l_arch, v_arch,
                         lc_scale=0.1, cl_scale=0.1)

    # Dense clause/literal adjacency (torch.sparse.mm -> dense 0/1 matmul here).
    G = jax.random.bernoulli(kg, 0.3, (num_clauses, num_lits)).astype(jnp.float32)

    prepped = prepare_params(params, d=embedding_dim)   # once, outside jit

    fwd = jax.jit(neurosat_forward)
    out = fwd(G, prepped)
    out = jax.block_until_ready(out)
    assert out.shape == (num_vars,), out.shape
    print("KERNEL_OK")
</pallas_src>

<mosaic_0001>
module attributes {stable_mosaic.version = 11 : i64} {
  func.func @_neurosat_kernel(%arg0: i32, %arg1: memref<32x32xf32, #tpu.memory_space<vmem>>, %arg2: memref<32x32xf32, #tpu.memory_space<vmem>>, %arg3: memref<32x128xf32, #tpu.memory_space<vmem>>, %arg4: memref<32x128xf32, #tpu.memory_space<vmem>>, %arg5: memref<1x128x128xbf16, #tpu.memory_space<vmem>>, %arg6: memref<1x128x128xbf16, #tpu.memory_space<vmem>>, %arg7: memref<1x1x128xf32, #tpu.memory_space<vmem>>, %arg8: memref<1x128x128xbf16, #tpu.memory_space<vmem>>, %arg9: memref<1x1x128xf32, #tpu.memory_space<vmem>>, %arg10: memref<1x128x128xbf16, #tpu.memory_space<vmem>>, %arg11: memref<1x128x128xbf16, #tpu.memory_space<vmem>>, %arg12: memref<1x128x128xbf16, #tpu.memory_space<vmem>>, %arg13: memref<1x1x128xf32, #tpu.memory_space<vmem>>, %arg14: memref<1x128x128xbf16, #tpu.memory_space<vmem>>, %arg15: memref<1x1x128xf32, #tpu.memory_space<vmem>>, %arg16: memref<128x128xbf16, #tpu.memory_space<vmem>>, %arg17: memref<128x128xbf16, #tpu.memory_space<vmem>>, %arg18: memref<1x128xf32, #tpu.memory_space<vmem>>, %arg19: memref<128x128xbf16, #tpu.memory_space<vmem>>, %arg20: memref<1x128xf32, #tpu.memory_space<vmem>>, %arg21: memref<128x128xbf16, #tpu.memory_space<vmem>>, %arg22: memref<1x128xf32, #tpu.memory_space<vmem>>, %arg23: memref<1x128xf32, #tpu.memory_space<vmem>>, %arg24: memref<1x1xf32, #tpu.memory_space<vmem>>, %arg25: memref<16x1xf32, #tpu.memory_space<vmem>>, %arg26: memref<32x128xf32, #tpu.memory_space<vmem>>, %arg27: memref<32x128xf32, #tpu.memory_space<vmem>>) attributes {dimension_semantics = [#tpu.dimension_semantics<arbitrary>], iteration_bounds = array<i64: 4>, scalar_prefetch = 0 : i64, scratch_operands = 2 : i64, tpu.core_type = #tpu.core_type<tc>, window_params = [{pipeline_mode = #tpu.pipeline_mode<synchronous>, transform_indices = @transform_0, window_bounds = array<i64: 32, 32>}, {pipeline_mode = #tpu.pipeline_mode<synchronous>, transform_indices = @transform_1, window_bounds = array<i64: 32, 32>}, {pipeline_mode = #tpu.pipeline_mode<synchronous>, transform_indices = @transform_2, window_bounds = array<i64: 32, 128>}, {pipeline_mode = #tpu.pipeline_mode<synchronous>, transform_indices = @transform_3, window_bounds = array<i64: 32, 128>}, {transform_indices = @transform_4, window_bounds = array<i64: 1, 128, 128>}, {transform_indices = @transform_5, window_bounds = array<i64: 1, 128, 128>}, {transform_indices = @transform_6, window_bounds = array<i64: 1, 1, 128>}, {transform_indices = @transform_7, window_bounds = array<i64: 1, 128, 128>}, {transform_indices = @transform_8, window_bounds = array<i64: 1, 1, 128>}, {transform_indices = @transform_9, window_bounds = array<i64: 1, 128, 128>}, {transform_indices = @transform_10, window_bounds = array<i64: 1, 128, 128>}, {transform_indices = @transform_11, window_bounds = array<i64: 1, 128, 128>}, {transform_indices = @transform_12, window_bounds = array<i64: 1, 1, 128>}, {transform_indices = @transform_13, window_bounds = array<i64: 1, 128, 128>}, {transform_indices = @transform_14, window_bounds = array<i64: 1, 1, 128>}, {pipeline_mode = #tpu.pipeline_mode<synchronous>, transform_indices = @transform_15, window_bounds = array<i64: 128, 128>}, {pipeline_mode = #tpu.pipeline_mode<synchronous>, transform_indices = @transform_16, window_bounds = array<i64: 128, 128>}, {pipeline_mode = #tpu.pipeline_mode<synchronous>, transform_indices = @transform_17, window_bounds = array<i64: 1, 128>}, {pipeline_mode = #tpu.pipeline_mode<synchronous>, transform_indices = @transform_18, window_bounds = array<i64: 128, 128>}, {pipeline_mode = #tpu.pipeline_mode<synchronous>, transform_indices = @transform_19, window_bounds = array<i64: 1, 128>}, {pipeline_mode = #tpu.pipeline_mode<synchronous>, transform_indices = @transform_20, window_bounds = array<i64: 128, 128>}, {pipeline_mode = #tpu.pipeline_mode<synchronous>, transform_indices = @transform_21, window_bounds = array<i64: 1, 128>}, {pipeline_mode = #tpu.pipeline_mode<synchronous>, transform_indices = @transform_22, window_bounds = array<i64: 1, 128>}, {pipeline_mode = #tpu.pipeline_mode<synchronous>, transform_indices = @transform_23, window_bounds = array<i64: 1, 1>}, {pipeline_mode = #tpu.pipeline_mode<synchronous>, transform_indices = @transform_24, window_bounds = array<i64: 16, 1>}]} {
    %c0_i32 = arith.constant 0 : i32
    %0 = arith.cmpi eq, %arg0, %c0_i32 : i32
    %1 = arith.extui %0 : i1 to i32
    %c0_i32_0 = arith.constant 0 : i32
    %2 = arith.cmpi ne, %1, %c0_i32_0 : i32
    scf.if %2 {
      %c0_56 = arith.constant 0 : index
      %c0_57 = arith.constant 0 : index
      %66 = vector.load %arg3[%c0_56, %c0_57] : memref<32x128xf32, #tpu.memory_space<vmem>>, vector<32x128xf32>
      %c0_58 = arith.constant 0 : index
      %c0_59 = arith.constant 0 : index
      %67 = vector.load %arg26[%c0_58, %c0_59] : memref<32x128xf32, #tpu.memory_space<vmem>>, vector<32x128xf32>
      tpu.vector_store %arg26[%c0_58, %c0_59], %66 {strides = array<i32>} : memref<32x128xf32, #tpu.memory_space<vmem>>, vector<32x128xf32>,
      %c0_60 = arith.constant 0 : index
      %c0_61 = arith.constant 0 : index
      %68 = vector.load %arg4[%c0_60, %c0_61] : memref<32x128xf32, #tpu.memory_space<vmem>>, vector<32x128xf32>
      %c0_62 = arith.constant 0 : index
      %c0_63 = arith.constant 0 : index
      %69 = vector.load %arg27[%c0_62, %c0_63] : memref<32x128xf32, #tpu.memory_space<vmem>>, vector<32x128xf32>
      tpu.vector_store %arg27[%c0_62, %c0_63], %68 {strides = array<i32>} : memref<32x128xf32, #tpu.memory_space<vmem>>, vector<32x128xf32>,
    } else {
    }
    %c0 = arith.constant 0 : index
    %c0_1 = arith.constant 0 : index
    %3 = vector.load %arg26[%c0, %c0_1] : memref<32x128xf32, #tpu.memory_space<vmem>>, vector<32x128xf32>
    %c0_2 = arith.constant 0 : index
    %c0_3 = arith.constant 0 : index
    %4 = vector.load %arg27[%c0_2, %c0_3] : memref<32x128xf32, #tpu.memory_space<vmem>>, vector<32x128xf32>
    %c0_4 = arith.constant 0 : index
    %c0_5 = arith.constant 0 : index
    %5 = vector.load %arg1[%c0_4, %c0_5] : memref<32x32xf32, #tpu.memory_space<vmem>>, vector<32x32xf32>
    %cst = arith.constant dense<0.000000e+00> : vector<32x128xf32>
    %6 = tpu.matmul %5, %3, %cst {dimension_numbers = #tpu.dot_dimension_numbers<[1], [0], [0], [1], [0, 0, 1, 1], [], []>} : vector<32x32xf32>, vector<32x128xf32>, vector<32x128xf32> -> vector<32x128xf32>
    %c0_6 = arith.constant 0 : index
    %c0_7 = arith.constant 0 : index
    %c0_8 = arith.constant 0 : index
    %7 = vector.load %arg7[%c0_6, %c0_7, %c0_8] : memref<1x1x128xf32, #tpu.memory_space<vmem>>, vector<1x1x128xf32>
    %8 = vector.shape_cast %7 : vector<1x1x128xf32> to vector<1x128xf32>
    %c0_9 = arith.constant 0 : index
    %c0_10 = arith.constant 0 : index
    %c0_11 = arith.constant 0 : index
    %9 = vector.load %arg5[%c0_9, %c0_10, %c0_11] : memref<1x128x128xbf16, #tpu.memory_space<vmem>>, vector<1x128x128xbf16>
    %10 = vector.shape_cast %9 : vector<1x128x128xbf16> to vector<128x128xbf16>
    %11 = arith.truncf %4 : vector<32x128xf32> to vector<32x128xbf16>
    %cst_12 = arith.constant dense<0.000000e+00> : vector<32x128xf32>
    %12 = tpu.matmul %11, %10, %cst_12 {dimension_numbers = #tpu.dot_dimension_numbers<[1], [0], [0], [1], [0, 0, 1, 1], [], []>} : vector<32x128xbf16>, vector<128x128xbf16>, vector<32x128xf32> -> vector<32x128xf32>
    %13 = vector.broadcast %8 : vector<1x128xf32> to vector<32x128xf32>
    %14 = arith.addf %13, %12 : vector<32x128xf32>
    %c0_13 = arith.constant 0 : index
    %c0_14 = arith.constant 0 : index
    %c0_15 = arith.constant 0 : index
    %15 = vector.load %arg6[%c0_13, %c0_14, %c0_15] : memref<1x128x128xbf16, #tpu.memory_space<vmem>>, vector<1x128x128xbf16>
    %16 = vector.shape_cast %15 : vector<1x128x128xbf16> to vector<128x128xbf16>
    %17 = arith.truncf %6 : vector<32x128xf32> to vector<32x128xbf16>
    %cst_16 = arith.constant dense<0.000000e+00> : vector<32x128xf32>
    %18 = tpu.matmul %17, %16, %cst_16 {dimension_numbers = #tpu.dot_dimension_numbers<[1], [0], [0], [1], [0, 0, 1, 1], [], []>} : vector<32x128xbf16>, vector<128x128xbf16>, vector<32x128xf32> -> vector<32x128xf32>
    %19 = arith.addf %14, %18 : vector<32x128xf32>
    %cst_17 = arith.constant 0.000000e+00 : f32
    %20 = vector.broadcast %cst_17 : f32 to vector<32x128xf32>
    %21 = arith.maximumf %19, %20 : vector<32x128xf32>
    %c0_18 = arith.constant 0 : index
    %c0_19 = arith.constant 0 : index
    %c0_20 = arith.constant 0 : index
    %22 = vector.load %arg8[%c0_18, %c0_19, %c0_20] : memref<1x128x128xbf16, #tpu.memory_space<vmem>>, vector<1x128x128xbf16>
    %23 = vector.shape_cast %22 : vector<1x128x128xbf16> to vector<128x128xbf16>
    %24 = arith.truncf %21 : vector<32x128xf32> to vector<32x128xbf16>
    %cst_21 = arith.constant dense<0.000000e+00> : vector<32x128xf32>
    %25 = tpu.matmul %24, %23, %cst_21 {dimension_numbers = #tpu.dot_dimension_numbers<[1], [0], [0], [1], [0, 0, 1, 1], [], []>} : vector<32x128xbf16>, vector<128x128xbf16>, vector<32x128xf32> -> vector<32x128xf32>
    %c0_22 = arith.constant 0 : index
    %c0_23 = arith.constant 0 : index
    %c0_24 = arith.constant 0 : index
    %26 = vector.load %arg9[%c0_22, %c0_23, %c0_24] : memref<1x1x128xf32, #tpu.memory_space<vmem>>, vector<1x1x128xf32>
    %27 = vector.shape_cast %26 : vector<1x1x128xf32> to vector<1x128xf32>
    %28 = vector.broadcast %27 : vector<1x128xf32> to vector<32x128xf32>
    %29 = arith.addf %25, %28 : vector<32x128xf32>
    %c0_25 = arith.constant 0 : index
    %c0_26 = arith.constant 0 : index
    %30 = vector.load %arg2[%c0_25, %c0_26] : memref<32x32xf32, #tpu.memory_space<vmem>>, vector<32x32xf32>
    %cst_27 = arith.constant dense<0.000000e+00> : vector<32x128xf32>
    %31 = tpu.matmul %30, %29, %cst_27 {dimension_numbers = #tpu.dot_dimension_numbers<[1], [0], [0], [1], [0, 0, 1, 1], [], []>} : vector<32x32xf32>, vector<32x128xf32>, vector<32x128xf32> -> vector<32x128xf32>
    %c16_i32 = arith.constant 16 : i32
    %32 = tpu.dynamic_rotate %3 by %c16_i32 dim 0 : vector<32x128xf32>, i32 -> vector<32x128xf32>
    %c0_28 = arith.constant 0 : index
    %c0_29 = arith.constant 0 : index
    %c0_30 = arith.constant 0 : index
    %33 = vector.load %arg13[%c0_28, %c0_29, %c0_30] : memref<1x1x128xf32, #tpu.memory_space<vmem>>, vector<1x1x128xf32>
    %34 = vector.shape_cast %33 : vector<1x1x128xf32> to vector<1x128xf32>
    %c0_31 = arith.constant 0 : index
    %c0_32 = arith.constant 0 : index
    %c0_33 = arith.constant 0 : index
    %35 = vector.load %arg10[%c0_31, %c0_32, %c0_33] : memref<1x128x128xbf16, #tpu.memory_space<vmem>>, vector<1x128x128xbf16>
    %36 = vector.shape_cast %35 : vector<1x128x128xbf16> to vector<128x128xbf16>
    %37 = arith.truncf %3 : vector<32x128xf32> to vector<32x128xbf16>
    %cst_34 = arith.constant dense<0.000000e+00> : vector<32x128xf32>
    %38 = tpu.matmul %37, %36, %cst_34 {dimension_numbers = #tpu.dot_dimension_numbers<[1], [0], [0], [1], [0, 0, 1, 1], [], []>} : vector<32x128xbf16>, vector<128x128xbf16>, vector<32x128xf32> -> vector<32x128xf32>
    %39 = vector.broadcast %34 : vector<1x128xf32> to vector<32x128xf32>
    %40 = arith.addf %39, %38 : vector<32x128xf32>
    %c0_35 = arith.constant 0 : index
    %c0_36 = arith.constant 0 : index
    %c0_37 = arith.constant 0 : index
    %41 = vector.load %arg11[%c0_35, %c0_36, %c0_37] : memref<1x128x128xbf16, #tpu.memory_space<vmem>>, vector<1x128x128xbf16>
    %42 = vector.shape_cast %41 : vector<1x128x128xbf16> to vector<128x128xbf16>
    %43 = arith.truncf %31 : vector<32x128xf32> to vector<32x128xbf16>
    %cst_38 = arith.constant dense<0.000000e+00> : vector<32x128xf32>
    %44 = tpu.matmul %43, %42, %cst_38 {dimension_numbers = #tpu.dot_dimension_numbers<[1], [0], [0], [1], [0, 0, 1, 1], [], []>} : vector<32x128xbf16>, vector<128x128xbf16>, vector<32x128xf32> -> vector<32x128xf32>
    %45 = arith.addf %40, %44 : vector<32x128xf32>
    %c0_39 = arith.constant 0 : index
    %c0_40 = arith.constant 0 : index
    %c0_41 = arith.constant 0 : index
    %46 = vector.load %arg12[%c0_39, %c0_40, %c0_41] : memref<1x128x128xbf16, #tpu.memory_space<vmem>>, vector<1x128x128xbf16>
    %47 = vector.shape_cast %46 : vector<1x128x128xbf16> to vector<128x128xbf16>
    %48 = arith.truncf %32 : vector<32x128xf32> to vector<32x128xbf16>
    %cst_42 = arith.constant dense<0.000000e+00> : vector<32x128xf32>
    %49 = tpu.matmul %48, %47, %cst_42 {dimension_numbers = #tpu.dot_dimension_numbers<[1], [0], [0], [1], [0, 0, 1, 1], [], []>} : vector<32x128xbf16>, vector<128x128xbf16>, vector<32x128xf32> -> vector<32x128xf32>
    %50 = arith.addf %45, %49 : vector<32x128xf32>
    %cst_43 = arith.constant 0.000000e+00 : f32
    %51 = vector.broadcast %cst_43 : f32 to vector<32x128xf32>
    %52 = arith.maximumf %50, %51 : vector<32x128xf32>
    %c0_44 = arith.constant 0 : index
    %c0_45 = arith.constant 0 : index
    %c0_46 = arith.constant 0 : index
    %53 = vector.load %arg14[%c0_44, %c0_45, %c0_46] : memref<1x128x128xbf16, #tpu.memory_space<vmem>>, vector<1x128x128xbf16>
    %54 = vector.shape_cast %53 : vector<1x128x128xbf16> to vector<128x128xbf16>
    %55 = arith.truncf %52 : vector<32x128xf32> to vector<32x128xbf16>
    %cst_47 = arith.constant dense<0.000000e+00> : vector<32x128xf32>
    %56 = tpu.matmul %55, %54, %cst_47 {dimension_numbers = #tpu.dot_dimension_numbers<[1], [0], [0], [1], [0, 0, 1, 1], [], []>} : vector<32x128xbf16>, vector<128x128xbf16>, vector<32x128xf32> -> vector<32x128xf32>
    %c0_48 = arith.constant 0 : index
    %c0_49 = arith.constant 0 : index
    %c0_50 = arith.constant 0 : index
    %57 = vector.load %arg15[%c0_48, %c0_49, %c0_50] : memref<1x1x128xf32, #tpu.memory_space<vmem>>, vector<1x1x128xf32>
    %58 = vector.shape_cast %57 : vector<1x1x128xf32> to vector<1x128xf32>
    %59 = vector.broadcast %58 : vector<1x128xf32> to vector<32x128xf32>
    %60 = arith.addf %56, %59 : vector<32x128xf32>
    %c0_51 = arith.constant 0 : index
    %c0_52 = arith.constant 0 : index
    %61 = vector.load %arg26[%c0_51, %c0_52] : memref<32x128xf32, #tpu.memory_space<vmem>>, vector<32x128xf32>
    tpu.vector_store %arg26[%c0_51, %c0_52], %60 {strides = array<i32>} : memref<32x128xf32, #tpu.memory_space<vmem>>, vector<32x128xf32>,
    %c0_53 = arith.constant 0 : index
    %c0_54 = arith.constant 0 : index
    %62 = vector.load %arg27[%c0_53, %c0_54] : memref<32x128xf32, #tpu.memory_space<vmem>>, vector<32x128xf32>
    tpu.vector_store %arg27[%c0_53, %c0_54], %29 {strides = array<i32>} : memref<32x128xf32, #tpu.memory_space<vmem>>, vector<32x128xf32>,
    %c3_i32 = arith.constant 3 : i32
    %63 = arith.cmpi eq, %arg0, %c3_i32 : i32
    %64 = arith.extui %63 : i1 to i32
    %c0_i32_55 = arith.constant 0 : i32
    %65 = arith.cmpi ne, %64, %c0_i32_55 : i32
    scf.if %65 {
      %66 = vector.extract_strided_slice %60 {offsets = [0, 0], sizes = [16, 128], strides = [1, 1]} : vector<32x128xf32> to vector<16x128xf32>
      %67 = vector.extract_strided_slice %60 {offsets = [16, 0], sizes = [16, 128], strides = [1, 1]} : vector<32x128xf32> to vector<16x128xf32>
      %c0_56 = arith.constant 0 : index
      %c0_57 = arith.constant 0 : index
      %68 = vector.load %arg18[%c0_56, %c0_57] : memref<1x128xf32, #tpu.memory_space<vmem>>, vector<1x128xf32>
      %c0_58 = arith.constant 0 : index
      %c0_59 = arith.constant 0 : index
      %69 = vector.load %arg16[%c0_58, %c0_59] : memref<128x128xbf16, #tpu.memory_space<vmem>>, vector<128x128xbf16>
      %70 = arith.truncf %66 : vector<16x128xf32> to vector<16x128xbf16>
      %cst_60 = arith.constant dense<0.000000e+00> : vector<16x128xf32>
      %71 = tpu.matmul %70, %69, %cst_60 {dimension_numbers = #tpu.dot_dimension_numbers<[1], [0], [0], [1], [0, 0, 1, 1], [], []>} : vector<16x128xbf16>, vector<128x128xbf16>, vector<16x128xf32> -> vector<16x128xf32>
      %72 = vector.broadcast %68 : vector<1x128xf32> to vector<16x128xf32>
      %73 = arith.addf %72, %71 : vector<16x128xf32>
      %c0_61 = arith.constant 0 : index
      %c0_62 = arith.constant 0 : index
      %74 = vector.load %arg17[%c0_61, %c0_62] : memref<128x128xbf16, #tpu.memory_space<vmem>>, vector<128x128xbf16>
      %75 = arith.truncf %67 : vector<16x128xf32> to vector<16x128xbf16>
      %cst_63 = arith.constant dense<0.000000e+00> : vector<16x128xf32>
      %76 = tpu.matmul %75, %74, %cst_63 {dimension_numbers = #tpu.dot_dimension_numbers<[1], [0], [0], [1], [0, 0, 1, 1], [], []>} : vector<16x128xbf16>, vector<128x128xbf16>, vector<16x128xf32> -> vector<16x128xf32>
      %77 = arith.addf %73, %76 : vector<16x128xf32>
      %cst_64 = arith.constant 0.000000e+00 : f32
      %78 = vector.broadcast %cst_64 : f32 to vector<16x128xf32>
      %79 = arith.maximumf %77, %78 : vector<16x128xf32>
      %c0_65 = arith.constant 0 : index
      %c0_66 = arith.constant 0 : index
      %80 = vector.load %arg19[%c0_65, %c0_66] : memref<128x128xbf16, #tpu.memory_space<vmem>>, vector<128x128xbf16>
      %81 = arith.truncf %79 : vector<16x128xf32> to vector<16x128xbf16>
      %cst_67 = arith.constant dense<0.000000e+00> : vector<16x128xf32>
      %82 = tpu.matmul %81, %80, %cst_67 {dimension_numbers = #tpu.dot_dimension_numbers<[1], [0], [0], [1], [0, 0, 1, 1], [], []>} : vector<16x128xbf16>, vector<128x128xbf16>, vector<16x128xf32> -> vector<16x128xf32>
      %c0_68 = arith.constant 0 : index
      %c0_69 = arith.constant 0 : index
      %83 = vector.load %arg20[%c0_68, %c0_69] : memref<1x128xf32, #tpu.memory_space<vmem>>, vector<1x128xf32>
      %84 = vector.broadcast %83 : vector<1x128xf32> to vector<16x128xf32>
      %85 = arith.addf %82, %84 : vector<16x128xf32>
      %cst_70 = arith.constant 0.000000e+00 : f32
      %86 = vector.broadcast %cst_70 : f32 to vector<16x128xf32>
      %87 = arith.maximumf %85, %86 : vector<16x128xf32>
      %c0_71 = arith.constant 0 : index
      %c0_72 = arith.constant 0 : index
      %88 = vector.load %arg21[%c0_71, %c0_72] : memref<128x128xbf16, #tpu.memory_space<vmem>>, vector<128x128xbf16>
      %89 = arith.truncf %87 : vector<16x128xf32> to vector<16x128xbf16>
      %cst_73 = arith.constant dense<0.000000e+00> : vector<16x128xf32>
      %90 = tpu.matmul %89, %88, %cst_73 {dimension_numbers = #tpu.dot_dimension_numbers<[1], [0], [0], [1], [0, 0, 1, 1], [], []>} : vector<16x128xbf16>, vector<128x128xbf16>, vector<16x128xf32> -> vector<16x128xf32>
      %c0_74 = arith.constant 0 : index
      %c0_75 = arith.constant 0 : index
      %91 = vector.load %arg22[%c0_74, %c0_75] : memref<1x128xf32, #tpu.memory_space<vmem>>, vector<1x128xf32>
      %92 = vector.broadcast %91 : vector<1x128xf32> to vector<16x128xf32>
      %93 = arith.addf %90, %92 : vector<16x128xf32>
      %cst_76 = arith.constant 0.000000e+00 : f32
      %94 = vector.broadcast %cst_76 : f32 to vector<16x128xf32>
      %95 = arith.maximumf %93, %94 : vector<16x128xf32>
      %c0_77 = arith.constant 0 : index
      %c0_78 = arith.constant 0 : index
      %96 = vector.load %arg23[%c0_77, %c0_78] : memref<1x128xf32, #tpu.memory_space<vmem>>, vector<1x128xf32>
      %97 = vector.broadcast %96 : vector<1x128xf32> to vector<16x128xf32>
      %98 = arith.mulf %95, %97 : vector<16x128xf32>
      %cst_79 = arith.constant dense<0.000000e+00> : vector<16xf32>
      %99 = vector.multi_reduction <add>, %98, %cst_79 [1] : vector<16x128xf32> to vector<16xf32>
      %100 = vector.shape_cast %99 : vector<16xf32> to vector<16x1xf32>
      %c0_80 = arith.constant 0 : index
      %c0_81 = arith.constant 0 : index
      %101 = vector.load %arg24[%c0_80, %c0_81] : memref<1x1xf32, #tpu.memory_space<vmem>>, vector<1x1xf32>
      %102 = vector.broadcast %101 : vector<1x1xf32> to vector<16x1xf32>
      %103 = arith.addf %100, %102 : vector<16x1xf32>
      %c0_82 = arith.constant 0 : index
      %c0_83 = arith.constant 0 : index
      %104 = vector.load %arg25[%c0_82, %c0_83] : memref<16x1xf32, #tpu.memory_space<vmem>>, vector<16x1xf32>
      tpu.vector_store %arg25[%c0_82, %c0_83], %103 {strides = array<i32>} : memref<16x1xf32, #tpu.memory_space<vmem>>, vector<16x1xf32>,
    } else {
    }
    return
  }
  func.func @transform_0(%arg0: i32) -> (i32, i32) {
    %c0_i32 = arith.constant 0 : i32
    %c0_i32_0 = arith.constant 0 : i32
    %c0_i32_1 = arith.constant 0 : i32
    return %c0_i32, %c0_i32_0 : i32, i32
  }
  func.func @transform_1(%arg0: i32) -> (i32, i32) {
    %c0_i32 = arith.constant 0 : i32
    %c0_i32_0 = arith.constant 0 : i32
    %c0_i32_1 = arith.constant 0 : i32
    return %c0_i32, %c0_i32_0 : i32, i32
  }
  func.func @transform_2(%arg0: i32) -> (i32, i32) {
    %c0_i32 = arith.constant 0 : i32
    %c0_i32_0 = arith.constant 0 : i32
    %c0_i32_1 = arith.constant 0 : i32
    return %c0_i32, %c0_i32_0 : i32, i32
  }
  func.func @transform_3(%arg0: i32) -> (i32, i32) {
    %c0_i32 = arith.constant 0 : i32
    %c0_i32_0 = arith.constant 0 : i32
    %c0_i32_1 = arith.constant 0 : i32
    return %c0_i32, %c0_i32_0 : i32, i32
  }
  func.func @transform_4(%arg0: i32) -> (i32, i32, i32) {
    %c0_i32 = arith.constant 0 : i32
    %c0_i32_0 = arith.constant 0 : i32
    %c0_i32_1 = arith.constant 0 : i32
    return %arg0, %c0_i32, %c0_i32_0 : i32, i32, i32
  }
  func.func @transform_5(%arg0: i32) -> (i32, i32, i32) {
    %c0_i32 = arith.constant 0 : i32
    %c0_i32_0 = arith.constant 0 : i32
    %c0_i32_1 = arith.constant 0 : i32
    return %arg0, %c0_i32, %c0_i32_0 : i32, i32, i32
  }
  func.func @transform_6(%arg0: i32) -> (i32, i32, i32) {
    %c0_i32 = arith.constant 0 : i32
    %c0_i32_0 = arith.constant 0 : i32
    %c0_i32_1 = arith.constant 0 : i32
    return %arg0, %c0_i32, %c0_i32_0 : i32, i32, i32
  }
  func.func @transform_7(%arg0: i32) -> (i32, i32, i32) {
    %c0_i32 = arith.constant 0 : i32
    %c0_i32_0 = arith.constant 0 : i32
    %c0_i32_1 = arith.constant 0 : i32
    return %arg0, %c0_i32, %c0_i32_0 : i32, i32, i32
  }
  func.func @transform_8(%arg0: i32) -> (i32, i32, i32) {
    %c0_i32 = arith.constant 0 : i32
    %c0_i32_0 = arith.constant 0 : i32
    %c0_i32_1 = arith.constant 0 : i32
    return %arg0, %c0_i32, %c0_i32_0 : i32, i32, i32
  }
  func.func @transform_9(%arg0: i32) -> (i32, i32, i32) {
    %c0_i32 = arith.constant 0 : i32
    %c0_i32_0 = arith.constant 0 : i32
    %c0_i32_1 = arith.constant 0 : i32
    return %arg0, %c0_i32, %c0_i32_0 : i32, i32, i32
  }
  func.func @transform_10(%arg0: i32) -> (i32, i32, i32) {
    %c0_i32 = arith.constant 0 : i32
    %c0_i32_0 = arith.constant 0 : i32
    %c0_i32_1 = arith.constant 0 : i32
    return %arg0, %c0_i32, %c0_i32_0 : i32, i32, i32
  }
  func.func @transform_11(%arg0: i32) -> (i32, i32, i32) {
    %c0_i32 = arith.constant 0 : i32
    %c0_i32_0 = arith.constant 0 : i32
    %c0_i32_1 = arith.constant 0 : i32
    return %arg0, %c0_i32, %c0_i32_0 : i32, i32, i32
  }
  func.func @transform_12(%arg0: i32) -> (i32, i32, i32) {
    %c0_i32 = arith.constant 0 : i32
    %c0_i32_0 = arith.constant 0 : i32
    %c0_i32_1 = arith.constant 0 : i32
    return %arg0, %c0_i32, %c0_i32_0 : i32, i32, i32
  }
  func.func @transform_13(%arg0: i32) -> (i32, i32, i32) {
    %c0_i32 = arith.constant 0 : i32
    %c0_i32_0 = arith.constant 0 : i32
    %c0_i32_1 = arith.constant 0 : i32
    return %arg0, %c0_i32, %c0_i32_0 : i32, i32, i32
  }
  func.func @transform_14(%arg0: i32) -> (i32, i32, i32) {
    %c0_i32 = arith.constant 0 : i32
    %c0_i32_0 = arith.constant 0 : i32
    %c0_i32_1 = arith.constant 0 : i32
    return %arg0, %c0_i32, %c0_i32_0 : i32, i32, i32
  }
  func.func @transform_15(%arg0: i32) -> (i32, i32) {
    %c0_i32 = arith.constant 0 : i32
    %c0_i32_0 = arith.constant 0 : i32
    %c0_i32_1 = arith.constant 0 : i32
    return %c0_i32, %c0_i32_0 : i32, i32
  }
  func.func @transform_16(%arg0: i32) -> (i32, i32) {
    %c0_i32 = arith.constant 0 : i32
    %c0_i32_0 = arith.constant 0 : i32
    %c0_i32_1 = arith.constant 0 : i32
    return %c0_i32, %c0_i32_0 : i32, i32
  }
  func.func @transform_17(%arg0: i32) -> (i32, i32) {
    %c0_i32 = arith.constant 0 : i32
    %c0_i32_0 = arith.constant 0 : i32
    %c0_i32_1 = arith.constant 0 : i32
    return %c0_i32, %c0_i32_0 : i32, i32
  }
  func.func @transform_18(%arg0: i32) -> (i32, i32) {
    %c0_i32 = arith.constant 0 : i32
    %c0_i32_0 = arith.constant 0 : i32
    %c0_i32_1 = arith.constant 0 : i32
    return %c0_i32, %c0_i32_0 : i32, i32
  }
  func.func @transform_19(%arg0: i32) -> (i32, i32) {
    %c0_i32 = arith.constant 0 : i32
    %c0_i32_0 = arith.constant 0 : i32
    %c0_i32_1 = arith.constant 0 : i32
    return %c0_i32, %c0_i32_0 : i32, i32
  }
  func.func @transform_20(%arg0: i32) -> (i32, i32) {
    %c0_i32 = arith.constant 0 : i32
    %c0_i32_0 = arith.constant 0 : i32
    %c0_i32_1 = arith.constant 0 : i32
    return %c0_i32, %c0_i32_0 : i32, i32
  }
  func.func @transform_21(%arg0: i32) -> (i32, i32) {
    %c0_i32 = arith.constant 0 : i32
    %c0_i32_0 = arith.constant 0 : i32
    %c0_i32_1 = arith.constant 0 : i32
    return %c0_i32, %c0_i32_0 : i32, i32
  }
  func.func @transform_22(%arg0: i32) -> (i32, i32) {
    %c0_i32 = arith.constant 0 : i32
    %c0_i32_0 = arith.constant 0 : i32
    %c0_i32_1 = arith.constant 0 : i32
    return %c0_i32, %c0_i32_0 : i32, i32
  }
  func.func @transform_23(%arg0: i32) -> (i32, i32) {
    %c0_i32 = arith.constant 0 : i32
    %c0_i32_0 = arith.constant 0 : i32
    %c0_i32_1 = arith.constant 0 : i32
    return %c0_i32, %c0_i32_0 : i32, i32
  }
  func.func @transform_24(%arg0: i32) -> (i32, i32) {
    %c0_i32 = arith.constant 0 : i32
    %c0_i32_0 = arith.constant 0 : i32
    %c0_i32_1 = arith.constant 0 : i32
    return %c0_i32, %c0_i32_0 : i32, i32
  }
}

</mosaic_0001>

<bundles_post_ra>
// kernel: neurosat_forward.1
= control target key start
LH: loop header
LB: loop body
LE: loop exit
PB: predicated region body
PF: predicated region fallthrough
CT: control target
= control target key end

     0   :  { %s4895_s0 = inlined_call_operand.vmem [shape: f32[32,32], index: 0, kind: input, shape index: {}]   ;;  %s4896_s1 = inlined_call_operand.vmem [shape: f32[32,32], index: 1, kind: input, shape index: {}]   ;;  %s4897_s2 = inlined_call_operand.vmem [shape: f32[32,128], index: 2, kind: input, shape index: {}]   ;;  %s4898_s3 = inlined_call_operand.vmem [shape: f32[32,128], index: 3, kind: input, shape index: {}]   ;;  %s4899_s4 = inlined_call_operand.hbm [shape: bf16[4,128,128], index: 4, kind: input, shape index: {}]   ;;  %s4900_s5 = inlined_call_operand.hbm [shape: bf16[4,128,128], index: 5, kind: input, shape index: {}]   ;;  %s4901_s6 = inlined_call_operand.vmem [shape: f32[4,1,128], index: 6, kind: input, shape index: {}]   ;;  %s4902_s7 = inlined_call_operand.hbm [shape: bf16[4,128,128], index: 7, kind: input, shape index: {}]   ;;  %s4903_s8 = inlined_call_operand.hbm [shape: f32[4,1,128], index: 8, kind: input, shape index: {}]   ;;  %s4904_s9 = inlined_call_operand.hbm [shape: bf16[4,128,128], index: 9, kind: input, shape index: {}]   ;;  %s4905_s10 = inlined_call_operand.hbm [shape: bf16[4,128,128], index: 10, kind: input, shape index: {}]   ;;  %s4906_s11 = inlined_call_operand.hbm [shape: bf16[4,128,128], index: 11, kind: input, shape index: {}]   ;;  %s4907_s12 = inlined_call_operand.vmem [shape: f32[4,1,128], index: 12, kind: input, shape index: {}]   ;;  %s4908_s13 = inlined_call_operand.hbm [shape: bf16[4,128,128], index: 13, kind: input, shape index: {}]   ;;  %s4909_s14 = inlined_call_operand.vmem [shape: f32[4,1,128], index: 14, kind: input, shape index: {}]   ;;  %s4910_s15 = inlined_call_operand.vmem [shape: bf16[128,128], index: 15, kind: input, shape index: {}]   ;;  %s4911_s16 = inlined_call_operand.vmem [shape: bf16[128,128], index: 16, kind: input, shape index: {}]   ;;  %s4912_s17 = inlined_call_operand.vmem [shape: f32[1,128], index: 17, kind: input, shape index: {}]   ;;  %s4913_s18 = inlined_call_operand.hbm [shape: bf16[128,128], index: 18, kind: input, shape index: {}]   ;;  %s4914_s19 = inlined_call_operand.vmem [shape: f32[1,128], index: 19, kind: input, shape index: {}]   ;;  %s4915_s20 = inlined_call_operand.hbm [shape: bf16[128,128], index: 20, kind: input, shape index: {}]   ;;  %s4916_s21 = inlined_call_operand.vmem [shape: f32[1,128], index: 21, kind: input, shape index: {}]   ;;  %s4917_s22 = inlined_call_operand.vmem [shape: f32[1,128], index: 22, kind: input, shape index: {}]   ;;  %s4918_s23 = inlined_call_operand.<no memory space> [shape: f32[1,1], index: 23, kind: input, shape index: {}]   ;;  %s4919_s24 = inlined_call_operand.vmem [shape: f32[16,1], index: 24, kind: output, shape index: {}]  }
   0x1   :  { %4952 = sst [smem:[#allocation31_spill]] %s4895_s0  ;;  %v29_v0 = vstv %s4918_s23 }
   0x2   :  { %4953 = sst [smem:[#allocation32_spill]] %s4896_s1  ;;  %30 = vst [vmem:[#allocation4] sm:$0x1] %v29_v0 }
   0x3   :  { %4954 = sst [smem:[#allocation33_spill]] %s4897_s2 }
   0x4   :  { %4955 = sst [smem:[#allocation34_spill]] %s4898_s3 }
   0x5   :  { %4956 = sst [smem:[#allocation35_spill]] %s4899_s4 }
   0x6   :  { %4957 = sst [smem:[#allocation36_spill]] %s4900_s5 }
   0x7   :  { %4958 = sst [smem:[#allocation37_spill]] %s4901_s6 }
   0x8   :  { %4959 = sst [smem:[#allocation38_spill]] %s4902_s7 }
   0x9   :  { %4960 = sst [smem:[#allocation39_spill]] %s4903_s8 }
   0xa   :  { %4961 = sst [smem:[#allocation40_spill]] %s4904_s9 }
   0xb   :  { %4962 = sst [smem:[#allocation41_spill]] %s4905_s10 }
   0xc   :  { %4963 = sst [smem:[#allocation42_spill]] %s4906_s11 }
   0xd   :  { %4964 = sst [smem:[#allocation43_spill]] %s4907_s12 }
   0xe   :  { %4965 = sst [smem:[#allocation44_spill]] %s4909_s14 }
   0xf   :  { %4966 = sst [smem:[#allocation45_spill]] %s4910_s15 }
  0x10   :  { %4967 = sst [smem:[#allocation46_spill]] %s4911_s16 }
  0x11   :  { %4968 = sst [smem:[#allocation47_spill]] %s4912_s17 }
  0x12   :  { %4969 = sst [smem:[#allocation48_spill]] %s4913_s18 }
  0x13   :  { %4970 = sst [smem:[#allocation49_spill]] %s4914_s19 }
  0x14   :  { %4971 = sst [smem:[#allocation50_spill]] %s4916_s21 }
  0x15   :  { %4972 = sst [smem:[#allocation51_spill]] %s4917_s22 }
  0x16   :  { %4973 = sst [smem:[#allocation52_spill]] %s4919_s24 }
  0x17   :  { %31 = vsyncpa [#allocation6], 0 }
  0x18   :  { %33 = vsyncpa [#allocation6 + $0x1], 0 }
  0x19   :  { %34 = vsyncpa [#allocation8], 0 }
  0x1a   :  { %36 = vsyncpa [#allocation8 + $0x1], 0 }
  0x1b   :  { %37 = vsyncpa [#allocation11], 0 }
  0x1c   :  { %39 = vsyncpa [#allocation11 + $0x1], 0 }
  0x1d   :  { %40 = vsyncpa [#allocation14], 0 }
  0x1e   :  { %42 = vsyncpa [#allocation14 + $0x1], 0 }
  0x1f   :  { %43 = vsyncpa [#allocation17], 0 }
  0x20   :  { %45 = vsyncpa [#allocation17 + $0x1], 0 }
  0x21   :  { %46 = vsyncpa [#allocation20], 0  ;;  %s4148_s27 = smov 0   ;;  %s4150_s28 = smov 0  }
  0x22   :  { %s4152_s6 = smov 0   ;;  %s4154_s2 = smov 0  }
  0x23 LB: > { %4974 = sst [smem:[#allocation28_spill]] %s4000_s6  ;;  %s4167_s23 = sadd.s32 4294967295, %s4004_s2   ;;  %s4004_s2 = sphi %s4154_s2, %s5030_s2   ;;  %s4000_s6 = sphi %s4152_s6, %s5032_s6   ;;  %s3996_s28 = sphi %s4150_s28, %s5034_s28   ;;  %s3992_s27 = sphi %s4148_s27, %s5033_s27  }
  0x24   : > { %s4170_s29 = sadd.s32 1, %s4004_s2   ;;  %s143_s7 = sadd.s32 1, %s4000_s6 }
  0x25   : > { %4975 = sst [smem:[#allocation29_spill]] %s4170_s29  ;;  %s140_s0 = ssub.s32 %s4004_s2, %s4170_s29 }
  0x26   : > { %p141_p0 = scmp.eq.s32.totalorder %s140_s0, 0  ;;  %p150_p1 = scmp.ne.s32.totalorder %s4000_s6, %s3996_s28 }
  0x27   : > { %p151_p2 = scmp.eq.s32.totalorder %s4004_s2, 0  ;;  %p156_p3 = scmp.ne.s32.totalorder %s3996_s28, %s3992_s27 }
  0x28   : > { %s4180_s30 = scalar_select %p141_p0, %s4000_s6, %s143_s7  }
  0x29   : > { %p4182_p4 = por %p151_p2, %p150_p1  ;;  %p4932_p5 = scmp.eq.s32.totalorder %s4167_s23, 0 }
  0x2a   : > { %4976 = sst [smem:[#allocation30_spill]] %s4180_s30  ;;  %p2899_p6 = scmp.ge.s32.totalorder %s4004_s2, 1 }
  0x2b   : > { %p637_p7 = scmp.lt.s32.totalorder %s4004_s2, 5  ;;  %p4191_p8 = por %p4932_p5, %p156_p3 }
  0x2c   : > { %s4006_s4 = smov [#allocation18]   ;;  %p3521_p13 = scmp.lt.s32.totalorder %s4004_s2, 4 }
  0x2d   : > { %s4978_s25 = scalar_select %p4191_p8, 1, 0 }
  0x2e   : > { %p4196_p10 = pnand %p2899_p6, %p637_p7  ;;  %s670_s1 = sshll.u32 %s4006_s4, 4  ;;  %s671_s1 = int_to_ptr.vmem [resolvable:$true] %s670_s1 }
  0x2f   : > { %s4210_s26 = sand.u32 1, %s4000_s6   ;;  %s4213_s27 = sshll.u32 %s4004_s2, 10 }
  0x30   : > { %s4979_s8 = scalar_select %p4196_p10, 1, 0 }
  0x31   : > { %p3487_p11 = pneg %p4196_p10  ;;  %p4217_p0 = pnand %p3521_p13, %p4182_p4 }
  0x32   : > { %s4982_s18 = sld [smem:[#allocation48_spill]] }
  0x33   : > { %p4204_p12 = pnand %p3487_p11, %p4932_p5 }
  0x34   : > { %s4981_s0 = scalar_select %p4217_p0, 1, 0 }
  0x35   : > { %s4980_s5 = scalar_select %p4204_p12, 1, 0 }
  0x36   : > { %p4941_p2 = pneg %p4204_p12 }
  0x38   : > { %s3650_s30 = scalar_lea.hbm %s4982_s18, 1024 }
  0x39   : > { %p3651_p1 = scmp.ne.s32.totalorder %s4982_s18, %s3650_s30  ;;  %p3657_p4 = scmp.lt.u32.totalorder %s3650_s30, %s4982_s18 }
  0x3b   : > { %p3653_p3 = pnand %p4941_p2, %p3651_p1 }
  0x3d   : > { %p3654_p6 = pneg %p3653_p3 }
  0x3f   : > { %p3659_p7 = pnand %p3657_p4, %p3654_p6 }
  0x41   : > { %3662 = shalt.err (!%p3659_p7)
}
  0x42   : > { %s3663_s22 = scalar_lea.vmem %s671_s1, 1024  ;;  %p3671_p5 = scmp.lt.s32.totalorder %s671_s1, %s671_s1 }
  0x43   : > { %p3664_p11 = scmp.ne.s32.totalorder %s671_s1, %s3663_s22  ;;  %p3672_p8 = scmp.lt.s32.totalorder %s3663_s22, %s3663_s22 }
  0x45   : > { %p3666_p13 = pnand %p3664_p11, %p4941_p2  ;;  %p3673_p10 = por %p3672_p8, %p3671_p5 }
  0x47   : > { %p3667_p9 = pneg %p3666_p13 }
  0x49   : > { %p3674_p0 = pnand %p3673_p10, %p3667_p9 }
  0x4b   : > { %3677 = shalt.err (!%p3674_p0)
}
  0x4c   : > { %s4937_s24 = smov 64   ;;  %s4939_s6 = smov 4  }
  0x4d   : > { %3490 = dma.hbm_to_vmem [thread:$0]  (!%p4204_p12), %s4982_s18, 1024, %s671_s1, [#allocation17], %s4937_s24, %s4937_s24, %s4939_s6  }
  0x4e   : > { %s4247_s7 = sshll.u32 %s4210_s26, 6  ;;  %s4250_s22 = sand.u32 1, %s4004_s2  }
  0x4f   : > { %s4983_s21 = sld [smem:[#allocation36_spill]]  ;;  %s734_s17 = scalar_lea.vmem [#allocation7], %s4247_s7 }
  0x50   : > { %s741_s16 = sshll.u32 %s734_s17, 4  ;;  %p4984_p8 = scmp.ne.s32.totalorder %s4981_s0, 0  ;;  %s4259_s16 = int_to_ptr.vmem [resolvable:$true] %s741_s16 }
  0x52   : > { %p4266_p9 = pneg %p4984_p8 }
  0x54   : > { %s4985_s30 = scalar_select %p4266_p9, 1, 0 }
  0x55   : > { %s4256_s19 = scalar_lea.hbm %s4983_s21, %s4213_s27  ;;  %s3683_s24 = scalar_lea.hbm %s4983_s21, 4096 }
  0x56   : > { %s3678_s29 = scalar_lea.hbm %s4256_s19, 1024  ;;  %p3684_p1 = scmp.lt.u32.totalorder %s4256_s19, %s4983_s21 }
  0x57   : > { %p3679_p5 = scmp.ne.s32.totalorder %s4256_s19, %s3678_s29  ;;  %p3685_p3 = scmp.lt.u32.totalorder %s3683_s24, %s3678_s29 }
  0x58   : > { %p3687_p4 = scmp.lt.u32.totalorder %s3678_s29, %s4256_s19 }
  0x59   : > { %p3681_p10 = pnand %p4266_p9, %p3679_p5  ;;  %p3686_p6 = por %p3685_p3, %p3684_p1 }
  0x5b   : > { %p3682_p0 = pneg %p3681_p10  ;;  %p3688_p7 = por %p3687_p4, %p3686_p6 }
  0x5d   : > { %p3689_p11 = pnand %p3688_p7, %p3682_p0 }
  0x5f   : > { %3692 = shalt.err (!%p3689_p11)
}
  0x60   : > { %s3693_s1 = scalar_lea.vmem %s4259_s16, 1024  ;;  %s4009_s4 = smov [#allocation7]  }
  0x61   : > { %p3694_p13 = scmp.ne.s32.totalorder %s4259_s16, %s3693_s1  ;;  %s3698_s3 = sshll.u32 %s4009_s4, 4  ;;  %s3699_s3 = int_to_ptr.vmem [resolvable:$false] %s3698_s3 }
  0x62   : > { %s3700_s6 = scalar_lea.vmem %s3699_s3, 2048  ;;  %p3701_p2 = scmp.lt.s32.totalorder %s4259_s16, %s3699_s3 }
  0x63   : > { %p3696_p5 = pnand %p3694_p13, %p4266_p9  ;;  %p3702_p12 = scmp.lt.s32.totalorder %s3700_s6, %s3693_s1 }
  0x65   : > { %p3697_p10 = pneg %p3696_p5  ;;  %p3703_p1 = por %p3702_p12, %p3701_p2 }
  0x67   : > { %p3704_p3 = pnand %p3703_p1, %p3697_p10 }
  0x69   : > { %3707 = shalt.err (!%p3704_p3)
}
  0x6a   : > { %s4986_s24 = smov 4   ;;  %s4987_s29 = smov 64  }
  0x6b   : > { %s4988_s17 = scalar_lea.sflag [#allocation8], %s4250_s22  ;;  %s2912_s4 = sshll.u32 %s4004_s2, 4 }
  0x6c   : > { %3500 = dma.hbm_to_vmem [thread:$0]  (!%p4984_p8), %s4256_s19, 1024, %s4259_s16, %s4988_s17, %s4987_s29, %s4987_s29, %s4986_s24  }
  0x6d   : > { %s781_s3 = scalar_lea.vmem [#allocation10], %s4210_s26  ;;  %s4989_s21 = sld [smem:[#allocation39_spill]] }
  0x6e   : > { %s788_s1 = sshll.u32 %s781_s3, 4  ;;  %s4947_s14 = scalar_lea.sflag [#allocation11], %s4250_s22  ;;  %s789_s1 = int_to_ptr.vmem [resolvable:$true] %s788_s1 }
  0x73   : > { %s4299_s15 = scalar_lea.hbm %s4989_s21, %s2912_s4  ;;  %s3713_s2 = scalar_lea.hbm %s4989_s21, 64 }
  0x74   : > { %s3708_s12 = scalar_lea.hbm %s4299_s15, 16  ;;  %p3714_p6 = scmp.lt.u32.totalorder %s4299_s15, %s4989_s21 }
  0x75   : > { %p3709_p12 = scmp.ne.s32.totalorder %s4299_s15, %s3708_s12  ;;  %p3715_p4 = scmp.lt.u32.totalorder %s3713_s2, %s3708_s12 }
  0x76   : > { %p3717_p11 = scmp.lt.u32.totalorder %s3708_s12, %s4299_s15 }
  0x77   : > { %p3711_p2 = pnand %p3709_p12, %p4266_p9  ;;  %p3716_p7 = por %p3715_p4, %p3714_p6 }
  0x79   : > { %p3712_p0 = pneg %p3711_p2  ;;  %p3718_p13 = por %p3717_p11, %p3716_p7 }
  0x7b   : > { %p3719_p5 = pnand %p3718_p13, %p3712_p0 }
  0x7d   : > { %3722 = shalt.err (!%p3719_p5)
}
  0x7e   : > { %s3723_s18 = scalar_lea.vmem %s789_s1, 16  ;;  %s4010_s4 = smov [#allocation10]  }
  0x7f   : > { %p3724_p10 = scmp.ne.s32.totalorder %s789_s1, %s3723_s18  ;;  %s3728_s6 = sshll.u32 %s4010_s4, 4  ;;  %s3729_s6 = int_to_ptr.vmem [resolvable:$false] %s3728_s6 }
  0x80   : > { %s3730_s16 = scalar_lea.vmem %s3729_s6, 32  ;;  %p3731_p12 = scmp.lt.s32.totalorder %s789_s1, %s3729_s6 }
  0x81   : > { %p3726_p1 = pnand %p3724_p10, %p4266_p9  ;;  %p3732_p2 = scmp.lt.s32.totalorder %s3730_s16, %s3723_s18 }
  0x83   : > { %p3727_p3 = pneg %p3726_p1  ;;  %p3733_p8 = por %p3732_p2, %p3731_p12 }
  0x85   : > { %p3734_p4 = pnand %p3733_p8, %p3727_p3 }
  0x87   : > { %3737 = shalt.err (!%p3734_p4)
}
  0x88   : > { %p4990_p6 = scmp.ne.s32.totalorder %s4981_s0, 0  ;;  %s4991_s10 = sld [smem:[#allocation41_spill]] }
  0x89   : > { %s820_s17 = scalar_lea.vmem [#allocation13], %s4247_s7  ;;  %s817_s18 = scalar_lea.sflag [#allocation14], %s4250_s22 }
  0x8a   : > { %3506 = dma.hbm_to_vmem [thread:$0]  (!%p4990_p6), %s4299_s15, 16, %s789_s1, %s4947_s14  }
  0x8b   : > { %s827_s3 = sshll.u32 %s820_s17, 4  ;;  %s4328_s3 = int_to_ptr.vmem [resolvable:$true] %s827_s3 }
  0x8e   : > { %s4325_s2 = scalar_lea.hbm %s4991_s10, %s4213_s27  ;;  %s3743_s6 = scalar_lea.hbm %s4991_s10, 4096 }
  0x8f   : > { %s3738_s4 = scalar_lea.hbm %s4325_s2, 1024  ;;  %p3744_p11 = scmp.lt.u32.totalorder %s4325_s2, %s4991_s10 }
  0x90   : > { %p3739_p8 = scmp.ne.s32.totalorder %s4325_s2, %s3738_s4  ;;  %p3745_p13 = scmp.lt.u32.totalorder %s3743_s6, %s3738_s4 }
  0x91   : > { %p3747_p10 = scmp.lt.u32.totalorder %s3738_s4, %s4325_s2 }
  0x92   : > { %p3741_p0 = pnand %p3739_p8, %p4266_p9  ;;  %p3746_p5 = por %p3745_p13, %p3744_p11 }
  0x94   : > { %p3742_p7 = pneg %p3741_p0  ;;  %p3748_p1 = por %p3747_p10, %p3746_p5 }
  0x96   : > { %p3749_p3 = pnand %p3748_p1, %p3742_p7 }
  0x98   : > { %3752 = shalt.err (!%p3749_p3)
}
  0x99   : > { %s3753_s19 = scalar_lea.vmem %s4328_s3, 1024  ;;  %s4011_s17 = smov [#allocation13]  }
  0x9a   : > { %p3754_p12 = scmp.ne.s32.totalorder %s4328_s3, %s3753_s19  ;;  %s3758_s15 = sshll.u32 %s4011_s17, 4  ;;  %s3759_s15 = int_to_ptr.vmem [resolvable:$false] %s3758_s15 }
  0x9b   : > { %s3760_s1 = scalar_lea.vmem %s3759_s15, 2048  ;;  %p3761_p8 = scmp.lt.s32.totalorder %s4328_s3, %s3759_s15 }
  0x9c   : > { %p3756_p2 = pnand %p3754_p12, %p4266_p9  ;;  %p3762_p0 = scmp.lt.s32.totalorder %s3760_s1, %s3753_s19 }
  0x9e   : > { %p3757_p4 = pneg %p3756_p2  ;;  %p3763_p11 = por %p3762_p0, %p3761_p8 }
  0xa0   : > { %p3764_p13 = pnand %p3763_p11, %p3757_p4 }
  0xa2   : > { %3767 = shalt.err (!%p3764_p13)
}
  0xa3   : > { %3512 = dma.hbm_to_vmem [thread:$0]  (!%p4990_p6), %s4325_s2, 1024, %s4328_s3, %s817_s18, %s4987_s29, %s4987_s29, %s4986_s24  }
  0xa4   : > { %s4012_s4 = smov [#allocation19]   ;;  %s3768_s19 = scalar_lea.hbm %s4915_s20, 1024 }
  0xa5   : > { %s686_s6 = sshll.u32 %s4012_s4, 4  ;;  %p3769_p7 = scmp.ne.s32.totalorder %s4915_s20, %s3768_s19  ;;  %s687_s6 = int_to_ptr.vmem [resolvable:$true] %s686_s6 }
  0xa6   : > { %p4992_p5 = scmp.ne.s32.totalorder %s4980_s5, 0  ;;  %p3775_p12 = scmp.lt.u32.totalorder %s3768_s19, %s4915_s20 }
  0xa8   : > { %p4993_p10 = pneg %p4992_p5 }
  0xaa   : > { %p3771_p1 = pnand %p3769_p7, %p4993_p10 }
  0xac   : > { %p3772_p3 = pneg %p3771_p1 }
  0xae   : > { %p3777_p2 = pnand %p3775_p12, %p3772_p3 }
  0xb0   : > { %3780 = shalt.err (!%p3777_p2)
}
  0xb1   : > { %s3781_s2 = scalar_lea.vmem %s687_s6, 1024  ;;  %p4994_p8 = pmov %p4993_p10 }
  0xb2   : > { %p3782_p4 = scmp.ne.s32.totalorder %s687_s6, %s3781_s2  ;;  %p3789_p13 = scmp.lt.s32.totalorder %s687_s6, %s687_s6 }
  0xb3   : > { %p3790_p6 = scmp.lt.s32.totalorder %s3781_s2, %s3781_s2 }
  0xb4   : > { %p3784_p0 = pnand %p3782_p4, %p4994_p8 }
  0xb5   : > { %p3791_p9 = por %p3790_p6, %p3789_p13 }
  0xb6   : > { %p3785_p11 = pneg %p3784_p0 }
  0xb8   : > { %p3792_p7 = pnand %p3791_p9, %p3785_p11 }
  0xba   : > { %3795 = shalt.err (!%p3792_p7)
}
  0xbb   : > { %3493 = dma.hbm_to_vmem [thread:$0]  (!%p4992_p5), %s4915_s20, 1024, %s687_s6, [#allocation20], %s4987_s29, %s4987_s29, %s4986_s24  }
  0xbc   : > { %s4995_s12 = sld [smem:[#allocation35_spill]]  ;;  %s713_s5 = scalar_lea.vmem [#allocation5], %s4247_s7 }
  0xbd   : > { %s720_s17 = sshll.u32 %s713_s5, 4  ;;  %s710_s15 = scalar_lea.sflag [#allocation6], %s4210_s26  ;;  %s4387_s17 = int_to_ptr.vmem [resolvable:$true] %s720_s17 }
  0xbe   : > { %p4996_p6 = scmp.ne.s32.totalorder %s4985_s30, 0 }
  0xc2   : > { %s4384_s19 = scalar_lea.hbm %s4995_s12, %s4213_s27  ;;  %s3801_s14 = scalar_lea.hbm %s4995_s12, 4096 }
  0xc3   : > { %s3796_s1 = scalar_lea.hbm %s4384_s19, 1024  ;;  %p3802_p5 = scmp.lt.u32.totalorder %s4384_s19, %s4995_s12 }
  0xc4   : > { %p3797_p9 = scmp.ne.s32.totalorder %s4384_s19, %s3796_s1  ;;  %p3803_p3 = scmp.lt.u32.totalorder %s3801_s14, %s3796_s1 }
  0xc5   : > { %p3805_p2 = scmp.lt.u32.totalorder %s3796_s1, %s4384_s19 }
  0xc6   : > { %p3799_p10 = pnand %p3797_p9, %p4996_p6  ;;  %p3804_p12 = por %p3803_p3, %p3802_p5 }
  0xc8   : > { %p3800_p1 = pneg %p3799_p10  ;;  %p3806_p4 = por %p3805_p2, %p3804_p12 }
  0xca   : > { %p3807_p8 = pnand %p3806_p4, %p3800_p1 }
  0xcc   : > { %3810 = shalt.err (!%p3807_p8)
}
  0xcd   : > { %s3811_s16 = scalar_lea.vmem %s4387_s17, 1024  ;;  %s4013_s5 = smov [#allocation5]  }
  0xce   : > { %p3812_p0 = scmp.ne.s32.totalorder %s4387_s17, %s3811_s16  ;;  %s3816_s6 = sshll.u32 %s4013_s5, 4  ;;  %s3817_s6 = int_to_ptr.vmem [resolvable:$false] %s3816_s6 }
  0xcf   : > { %s3818_s2 = scalar_lea.vmem %s3817_s6, 2048  ;;  %p3819_p7 = scmp.lt.s32.totalorder %s4387_s17, %s3817_s6 }
  0xd0   : > { %p3814_p11 = pnand %p3812_p0, %p4996_p6  ;;  %p3820_p9 = scmp.lt.s32.totalorder %s3818_s2, %s3811_s16 }
  0xd2   : > { %p3815_p13 = pneg %p3814_p11  ;;  %p3821_p10 = por %p3820_p9, %p3819_p7 }
  0xd4   : > { %p3822_p5 = pnand %p3821_p10, %p3815_p13 }
  0xd6   : > { %3825 = shalt.err (!%p3822_p5)
}
  0xd7   : > { %p4997_p1 = scmp.ne.s32.totalorder %s4981_s0, 0  ;;  %s4998_s3 = sld [smem:[#allocation38_spill]] }
  0xd8   : > { %s761_s16 = scalar_lea.vmem [#allocation9], %s4247_s7 }
  0xd9   : > { %3497 = dma.hbm_to_vmem [thread:$0]  (!%p4997_p1), %s4384_s19, 1024, %s4387_s17, %s710_s15, %s4987_s29, %s4987_s29, %s4986_s24  }
  0xda   : > { %s768_s5 = sshll.u32 %s761_s16, 4  ;;  %s4423_s5 = int_to_ptr.vmem [resolvable:$true] %s768_s5 }
  0xdd   : > { %s4420_s4 = scalar_lea.hbm %s4998_s3, %s4213_s27  ;;  %s3831_s17 = scalar_lea.hbm %s4998_s3, 4096 }
  0xde   : > { %s3826_s26 = scalar_lea.hbm %s4420_s4, 1024  ;;  %p3832_p4 = scmp.lt.u32.totalorder %s4420_s4, %s4998_s3 }
  0xdf   : > { %p3827_p3 = scmp.ne.s32.totalorder %s4420_s4, %s3826_s26  ;;  %p3833_p8 = scmp.lt.u32.totalorder %s3831_s17, %s3826_s26 }
  0xe0   : > { %p3835_p11 = scmp.lt.u32.totalorder %s3826_s26, %s4420_s4 }
  0xe1   : > { %p3829_p12 = pnand %p3827_p3, %p4996_p6  ;;  %p3834_p0 = por %p3833_p8, %p3832_p4 }
  0xe3   : > { %p3830_p2 = pneg %p3829_p12  ;;  %p3836_p13 = por %p3835_p11, %p3834_p0 }
  0xe5   : > { %p3837_p7 = pnand %p3836_p13, %p3830_p2 }
  0xe7   : > { %3840 = shalt.err (!%p3837_p7)
}
  0xe8   : > { %s3841_s1 = scalar_lea.vmem %s4423_s5, 1024  ;;  %s4014_s14 = smov [#allocation9]  }
  0xe9   : > { %p3842_p9 = scmp.ne.s32.totalorder %s4423_s5, %s3841_s1  ;;  %s3846_s16 = sshll.u32 %s4014_s14, 4  ;;  %s3847_s16 = int_to_ptr.vmem [resolvable:$false] %s3846_s16 }
  0xea   : > { %s3848_s6 = scalar_lea.vmem %s3847_s16, 2048  ;;  %p3849_p3 = scmp.lt.s32.totalorder %s4423_s5, %s3847_s16 }
  0xeb   : > { %p3844_p10 = pnand %p3842_p9, %p4996_p6  ;;  %p3850_p12 = scmp.lt.s32.totalorder %s3848_s6, %s3841_s1 }
  0xed   : > { %p3845_p5 = pneg %p3844_p10  ;;  %p3851_p4 = por %p3850_p12, %p3849_p3 }
  0xef   : > { %p3852_p8 = pnand %p3851_p4, %p3845_p5 }
  0xf1   : > { %3855 = shalt.err (!%p3852_p8)
}
  0xf2   : > { %s4999_s26 = scalar_lea.sflag [#allocation8], %s4250_s22  ;;  %s5000_s9 = sld [smem:[#allocation40_spill]] }
  0xf3   : > { %3503 = dma.hbm_to_vmem [thread:$0]  (!%p4997_p1), %s4420_s4, 1024, %s4423_s5, %s4999_s26, %s4987_s29, %s4987_s29, %s4986_s24  }
  0xf4   : > { %s799_s2 = scalar_lea.vmem [#allocation12], %s4247_s7 }
  0xf5   : > { %s806_s1 = sshll.u32 %s799_s2, 4  ;;  %s4458_s1 = int_to_ptr.vmem [resolvable:$true] %s806_s1 }
  0xf8   : > { %s4455_s15 = scalar_lea.hbm %s5000_s9, %s4213_s27  ;;  %s3861_s5 = scalar_lea.hbm %s5000_s9, 4096 }
  0xf9   : > { %s3856_s14 = scalar_lea.hbm %s4455_s15, 1024  ;;  %p3862_p13 = scmp.lt.u32.totalorder %s4455_s15, %s5000_s9 }
  0xfa   : > { %p3857_p2 = scmp.ne.s32.totalorder %s4455_s15, %s3856_s14  ;;  %p3863_p7 = scmp.lt.u32.totalorder %s3861_s5, %s3856_s14 }
  0xfb   : > { %p3865_p10 = scmp.lt.u32.totalorder %s3856_s14, %s4455_s15 }
  0xfc   : > { %p3859_p0 = pnand %p3857_p2, %p4996_p6  ;;  %p3864_p9 = por %p3863_p7, %p3862_p13 }
  0xfe   : > { %p3860_p11 = pneg %p3859_p0  ;;  %p3866_p5 = por %p3865_p10, %p3864_p9 }
 0x100   : > { %p3867_p3 = pnand %p3866_p5, %p3860_p11 }
 0x102   : > { %3870 = shalt.err (!%p3867_p3)
}
 0x103   : > { %s3871_s19 = scalar_lea.vmem %s4458_s1, 1024  ;;  %s4015_s17 = smov [#allocation12]  }
 0x104   : > { %p3872_p12 = scmp.ne.s32.totalorder %s4458_s1, %s3871_s19  ;;  %s3876_s2 = sshll.u32 %s4015_s17, 4  ;;  %s3877_s2 = int_to_ptr.vmem [resolvable:$false] %s3876_s2 }
 0x105   : > { %s3878_s16 = scalar_lea.vmem %s3877_s2, 2048  ;;  %p3879_p2 = scmp.lt.s32.totalorder %s4458_s1, %s3877_s2 }
 0x106   : > { %p3874_p4 = pnand %p3872_p12, %p4996_p6  ;;  %p3880_p0 = scmp.lt.s32.totalorder %s3878_s16, %s3871_s19 }
 0x108   : > { %p3875_p8 = pneg %p3874_p4  ;;  %p3881_p13 = por %p3880_p0, %p3879_p2 }
 0x10a   : > { %p3882_p7 = pnand %p3881_p13, %p3875_p8 }
 0x10c   : > { %3885 = shalt.err (!%p3882_p7)
}
 0x10d   : > { %s5001_s14 = scalar_lea.sflag [#allocation11], %s4250_s22  ;;  %s5002_s11 = sld [smem:[#allocation42_spill]] }
 0x10e   : > { %3509 = dma.hbm_to_vmem [thread:$0]  (!%p4997_p1), %s4455_s15, 1024, %s4458_s1, %s5001_s14, %s4987_s29, %s4987_s29, %s4986_s24  }
 0x10f   : > { %s841_s26 = scalar_lea.vmem [#allocation15], %s4247_s7 }
 0x110   : > { %s848_s19 = sshll.u32 %s841_s26, 4  ;;  %s4493_s19 = int_to_ptr.vmem [resolvable:$true] %s848_s19 }
 0x113   : > { %s4490_s6 = scalar_lea.hbm %s5002_s11, %s4213_s27  ;;  %s3891_s1 = scalar_lea.hbm %s5002_s11, 4096 }
 0x114   : > { %s3886_s17 = scalar_lea.hbm %s4490_s6, 1024  ;;  %p3892_p5 = scmp.lt.u32.totalorder %s4490_s6, %s5002_s11 }
 0x115   : > { %p3887_p11 = scmp.ne.s32.totalorder %s4490_s6, %s3886_s17  ;;  %p3893_p3 = scmp.lt.u32.totalorder %s3891_s1, %s3886_s17 }
 0x116   : > { %p3895_p4 = scmp.lt.u32.totalorder %s3886_s17, %s4490_s6 }
 0x117   : > { %p3889_p9 = pnand %p3887_p11, %p4996_p6  ;;  %p3894_p12 = por %p3893_p3, %p3892_p5 }
 0x119   : > { %p3890_p10 = pneg %p3889_p9  ;;  %p3896_p8 = por %p3895_p4, %p3894_p12 }
 0x11b   : > { %p3897_p2 = pnand %p3896_p8, %p3890_p10 }
 0x11d   : > { %3900 = shalt.err (!%p3897_p2)
}
 0x11e   : > { %s3901_s4 = scalar_lea.vmem %s4493_s19, 1024  ;;  %s4016_s5 = smov [#allocation15]  }
 0x11f   : > { %p3902_p0 = scmp.ne.s32.totalorder %s4493_s19, %s3901_s4  ;;  %s3906_s26 = sshll.u32 %s4016_s5, 4  ;;  %s3907_s26 = int_to_ptr.vmem [resolvable:$false] %s3906_s26 }
 0x120   : > { %s3908_s2 = scalar_lea.vmem %s3907_s26, 2048  ;;  %p3909_p11 = scmp.lt.s32.totalorder %s4493_s19, %s3907_s26 }
 0x121   : > { %p3904_p13 = pnand %p3902_p0, %p4996_p6  ;;  %p3910_p9 = scmp.lt.s32.totalorder %s3908_s2, %s3901_s4 }
 0x123   : > { %p3905_p7 = pneg %p3904_p13  ;;  %p3911_p5 = por %p3910_p9, %p3909_p11 }
 0x125   : > { %p3912_p3 = pnand %p3911_p5, %p3905_p7 }
 0x127   : > { %3915 = shalt.err (!%p3912_p3)
}
 0x128   : > { %3515 = dma.hbm_to_vmem [thread:$0]  (!%p4997_p1), %s4490_s6, 1024, %s4493_s19, %s817_s18, %s4987_s29, %s4987_s29, %s4986_s24  }
 0x129   : > { %s4525_s1 = scalar_lea.hbm %s4908_s13, %s4213_s27  ;;  %s868_s16 = scalar_lea.vmem [#allocation16], %s4247_s7 }
 0x12a   : > { %s875_s14 = sshll.u32 %s868_s16, 4  ;;  %s865_s4 = scalar_lea.sflag [#allocation17], %s4250_s22  ;;  %s4528_s14 = int_to_ptr.vmem [resolvable:$true] %s875_s14 }
 0x12b   : > { %s3916_s5 = scalar_lea.hbm %s4525_s1, 1024  ;;  %s3921_s19 = scalar_lea.hbm %s4908_s13, 4096 }
 0x12c   : > { %p3917_p10 = scmp.ne.s32.totalorder %s4525_s1, %s3916_s5  ;;  %p3922_p8 = scmp.lt.u32.totalorder %s4525_s1, %s4908_s13 }
 0x12d   : > { %p3923_p2 = scmp.lt.u32.totalorder %s3921_s19, %s3916_s5  ;;  %p3925_p13 = scmp.lt.u32.totalorder %s3916_s5, %s4525_s1 }
 0x12e   : > { %p3919_p12 = pnand %p3917_p10, %p4996_p6 }
 0x12f   : > { %p3924_p0 = por %p3923_p2, %p3922_p8 }
 0x130   : > { %p3920_p4 = pneg %p3919_p12 }
 0x131   : > { %p3926_p7 = por %p3925_p13, %p3924_p0 }
 0x133   : > { %p3927_p11 = pnand %p3926_p7, %p3920_p4 }
 0x135   : > { %3930 = shalt.err (!%p3927_p11)
}
 0x136   : > { %s3931_s7 = scalar_lea.vmem %s4528_s14, 1024  ;;  %s4017_s2 = smov [#allocation16]  }
 0x137   : > { %p3932_p9 = scmp.ne.s32.totalorder %s4528_s14, %s3931_s7  ;;  %s3936_s17 = sshll.u32 %s4017_s2, 4  ;;  %s3937_s17 = int_to_ptr.vmem [resolvable:$false] %s3936_s17 }
 0x138   : > { %s3938_s15 = scalar_lea.vmem %s3937_s17, 2048  ;;  %p3939_p10 = scmp.lt.s32.totalorder %s4528_s14, %s3937_s17 }
 0x139   : > { %p3934_p5 = pnand %p3932_p9, %p4996_p6  ;;  %p3940_p12 = scmp.lt.s32.totalorder %s3938_s15, %s3931_s7 }
 0x13b   : > { %p3935_p3 = pneg %p3934_p5  ;;  %p3941_p8 = por %p3940_p12, %p3939_p10 }
 0x13d   : > { %p3942_p2 = pnand %p3941_p8, %p3935_p3 }
 0x13f   : > { %3945 = shalt.err (!%p3942_p2)
}
 0x140   : > { %3518 = dma.hbm_to_vmem [thread:$0]  (!%p4997_p1), %s4525_s1, 1024, %s4528_s14, %s865_s4, %s4987_s29, %s4987_s29, %s4986_s24  }
 0x141   : > { %p5003_p6 = scmp.ne.s32.totalorder %s4979_s8, 0 }
 0x142   : > { %s4560_s30 = sand.u32 (!%p5003_p6), 1, %s3996_s28   ;;  %p5004_p4 = scmp.ne.s32.totalorder (!%p5003_p6), %s4978_s25, 0 }
 0x143   : > { %893 = sbr.rel (%p5003_p6) target bundleno = 2580 (0xa14), region = 116  ;;  %s2926_s16 = sshll.u32 (!%p5003_p6), %s4560_s30, 6 }
 0x144   : > { %s896_s5 = scalar_lea.sflag (!%p5003_p6), [#allocation6], %s4560_s30  ;;  %s4564_s0 = scalar_lea.vmem (!%p5003_p6), [#allocation5], %s2926_s16 }
 0x14a   : > { %3963 = dma.done.wait (%p5004_p4), %s896_s5, 1024  }
 0x14b   : > { %3965 = vsyncadd (%p5004_p4), %s896_s5, 4294966272  ;;  %s904_s22 = sand.u32 1, %s4167_s23   ;;  %s4571_s24 = scalar_lea.vmem [#allocation7], %s2926_s16 }
 0x14c   : > { %s905_s8 = scalar_lea.sflag [#allocation8], %s904_s22 }
 0x14d   : > { %3967 = dma.done.wait (%p5004_p4), %s905_s8, 2048  }
 0x14e   : > { %3969 = vsyncadd (%p5004_p4), %s905_s8, 4294965248  ;;  %s4577_s29 = scalar_lea.vmem [#allocation9], %s2926_s16  ;;  %s923_s1 = scalar_lea.sflag [#allocation11], %s904_s22 }
 0x14f   : > { %3971 = dma.done.wait (%p5004_p4), %s923_s1, 1040  }
 0x150   : > { %3973 = vsyncadd (%p5004_p4), %s923_s1, 4294966256  ;;  %s4584_s4 = scalar_lea.vmem [#allocation12], %s2926_s16  ;;  %s940_s18 = scalar_lea.sflag [#allocation14], %s904_s22 }
 0x151   : > { %s4586_s6 = scalar_lea.vmem [#allocation13], %s2926_s16 }
 0x152   : > { %3975 = dma.done.wait (%p5004_p4), %s940_s18, 2048  }
 0x153   : > { %3977 = vsyncadd (%p5004_p4), %s940_s18, 4294965248  ;;  %s4592_s19 = scalar_lea.vmem [#allocation15], %s2926_s16  ;;  %s958_s27 = scalar_lea.sflag [#allocation17], %s904_s22 }
 0x154   : > { %s4594_s26 = scalar_lea.vmem [#allocation16], %s2926_s16 }
 0x155   : > { %3979 = dma.done.wait (%p5004_p4), %s958_s27, 1024  }
 0x156   : > { %3981 = vsyncadd (%p5004_p4), %s958_s27, 4294966272  ;;  %p5005_p1 = scmp.eq.s32.totalorder %s4167_s23, 0 }
 0x158   : > { %3983 = dma.done.wait (%p5005_p1), [#allocation17], 1024   ;;  %p5006_p0 = pmov %p5005_p1 }
 0x15a   : > { %3985 = vsyncadd (%p5006_p0), [#allocation17], 4294966272  ;;  %p5007_p13 = pmov %p5006_p0 }
 0x15b   : > { %p5008_p7 = pmov %p5006_p0 }
 0x15c   : > { %3987 = dma.done.wait (%p5007_p13), [#allocation20], 1024  }
 0x15d   : > { %3989 = vsyncadd (%p5008_p7), [#allocation20], 4294966272  ;;  %p1072_p11 = scmp.lt.s32.totalorder %s4167_s23, 3  ;;  %s5009_s17 = sld [smem:[#allocation37_spill]] }
 0x15e   : > { %s5010_s22 = sld [smem:[#allocation43_spill]]  ;;  %s5011_s27 = sld [smem:[#allocation44_spill]] }
 0x15f   : > { %s4610_s7 = scalar_select %p1072_p11, %s4167_s23, 3 }
 0x160   : > { %p5012_p9 = scmp.ne.s32.totalorder %s4167_s23, 0 }
 0x161   : > { %s5013_s10 = sld [smem:[#allocation33_spill]] (!%p5012_p9)  ;;  %s5014_s18 = sld [smem:[#allocation34_spill]] (!%p5012_p9) }
 0x162   : > { %1085 = sbr.rel (%p5012_p9) target bundleno = 364 (0x16c), region = 160 }
 0x163   : > { %s1074_s15 = scalar_lea.vmem %s5009_s17, %s4610_s7 }
 0x164   : > { %s1077_s8 = scalar_lea.vmem %s5010_s22, %s4610_s7  ;;  %s1080_s14 = scalar_lea.vmem %s5011_s27, %s4610_s7 }
 0x167   : > { %v1086_v1 = vld [vmem:[%s5013_s10] sm:$0xff] (!%p5012_p9)  ;;  %v1087_v2 = vld [vmem:[%s5013_s10 + $0x8] sm:$0xff] (!%p5012_p9)  ;;  %v1088_v3 = vld [vmem:[%s5013_s10 + $0x10] sm:$0xff] (!%p5012_p9) }
 0x168   : > { %1090 = vst [vmem:[#allocation2] sm:$0xff] (!%p5012_p9), %v1086_v1  ;;  %1091 = vst [vmem:[#allocation2 + $0x8] sm:$0xff] (!%p5012_p9), %v1087_v2  ;;  %v1089_v4 = vld [vmem:[%s5013_s10 + $0x18] sm:$0xff] (!%p5012_p9)  ;;  %v1094_v5 = vld [vmem:[%s5014_s18] sm:$0xff] (!%p5012_p9) }
 0x169   : > { %1092 = vst [vmem:[#allocation2 + $0x10] sm:$0xff] %v1088_v3  ;;  %v1095_v6 = vld [vmem:[%s5014_s18 + $0x8] sm:$0xff]  ;;  %1093 = vst [vmem:[#allocation2 + $0x18] sm:$0xff] %v1089_v4  ;;  %v1096_v7 = vld [vmem:[%s5014_s18 + $0x10] sm:$0xff] }
 0x16a   : > { %1098 = vst [vmem:[#allocation3] sm:$0xff] %v1094_v5  ;;  %1099 = vst [vmem:[#allocation3 + $0x8] sm:$0xff] %v1095_v6  ;;  %v1097_v8 = vld [vmem:[%s5014_s18 + $0x18] sm:$0xff] }
 0x16b   : > { %1100 = vst [vmem:[#allocation3 + $0x10] sm:$0xff] %v1096_v7  ;;  %1101 = vst [vmem:[#allocation3 + $0x18] sm:$0xff] %v1097_v8 }
 0x16c PF: > { %vm1114_vm0 = vcmask 261120   ;;  %s5015_s5 = sld [smem:[#allocation31_spill]]  ;;  %v3562_v16 = vld [vmem:[%s4564_s0] sm:$0xff]   ;;  %v3563_v17 = vld [vmem:[%s4564_s0 + $0x8] sm:$0xff]   ;;  %v3564_v18 = vld [vmem:[%s4564_s0 + $0x10] sm:$0xff]   ;;  %s5018_s17 = scalar_lea.vmem [#allocation10], %s4560_s30 }
 0x16d   : > { %3187 = vmatprep.subr.bf16.mxu1 %v3562_v16  ;;  %v3565_v21 = vld [vmem:[%s4564_s0 + $0x18] sm:$0xff]   ;;  %v3566_v26 = vld [vmem:[%s4564_s0 + $0x20] sm:$0xff]   ;;  %v3567_v27 = vld [vmem:[%s4564_s0 + $0x28] sm:$0xff]   ;;  %p3004_p5 = scmp.ne.s32.totalorder %s4167_s23, 3 }
 0x16e   : > { %3188 = vmatpush3.bf16.msra.mxu1 %v3562_v16  ;;  %v3568_v28 = vld [vmem:[%s4564_s0 + $0x30] sm:$0xff]   ;;  %v3569_v29 = vld [vmem:[%s4564_s0 + $0x38] sm:$0xff]   ;;  %v3570_v32 = vld [vmem:[%s4571_s24] sm:$0xff]   ;;  %s5021_s27 = sld [smem:[#allocation45_spill]] (!%p3004_p5)  ;;  %vm4019_vm1 = vmmov (!%p3004_p5), 0   ;;  %s5026_s7 = sld [smem:[#allocation50_spill]] (!%p3004_p5) }
 0x16f   : > { %3189 = vmatprep.subr.bf16.mxu1 %v3563_v17  ;;  %v3571_v34 = vld [vmem:[%s4571_s24 + $0x8] sm:$0xff]   ;;  %v3572_v35 = vld [vmem:[%s4571_s24 + $0x10] sm:$0xff]   ;;  %v3573_v36 = vld [vmem:[%s4571_s24 + $0x18] sm:$0xff]   ;;  %s5027_s25 = sld [smem:[#allocation51_spill]] (!%p3004_p5)  ;;  %vm2661_vm2 = vcmask (!%p3004_p5), 7168   ;;  %s5028_s2 = sld [smem:[#allocation52_spill]] (!%p3004_p5) }
 0x170   : > { %v3574_v37 = vld [vmem:[%s4571_s24 + $0x20] sm:$0xff]   ;;  %v3575_v38 = vld [vmem:[%s4571_s24 + $0x28] sm:$0xff]   ;;  %v3576_v39 = vld [vmem:[%s4571_s24 + $0x30] sm:$0xff]  }
 0x171   : > { %v1106_v22 = vld [vmem:[#allocation3] sm:$0xff]  ;;  %v1107_v23 = vld [vmem:[#allocation3 + $0x8] sm:$0xff]  ;;  %v3580_v49 = vld [vmem:[%s4577_s29 + $0x10] sm:$0xff]  }
 0x172   : > { %v1102_v9 = vld [vmem:[#allocation2] sm:$0xff]  ;;  %v1103_v10 = vld [vmem:[#allocation2 + $0x8] sm:$0xff]  ;;  %v1112_v20 = vld [vmem:[%s5015_s5 + $0x10] sm:$0xff]  ;;  %3190 = vmatpush3.bf16.msra.mxu1 %v3563_v17  ;;  %v1229_v25 = vpack.c.bf16 %v1107_v23, %v1106_v22 }
 0x173   : > { %v1104_v11 = vld [vmem:[#allocation2 + $0x10] sm:$0xff]  ;;  %v4650_v12 = vpack.c.bf16 %v1103_v10, %v1102_v9  ;;  %v1105_v13 = vld [vmem:[#allocation2 + $0x18] sm:$0xff]  ;;  %v1110_v14 = vld [vmem:[%s5015_s5] sm:$0xff]  ;;  %3191 = vmatprep.subr.bf16.mxu1 %v3564_v18 }
 0x174   : > { %v4655_v15 = vpack.c.bf16 %v1105_v13, %v1104_v11  ;;  %3181 = vmatprep.mubr.msk.f32.mxu0 %vm1114_vm0, %v1110_v14  ;;  %v1111_v19 = vld [vmem:[%s5015_s5 + $0x8] sm:$0xff]  ;;  %v1113_v24 = vld [vmem:[%s5015_s5 + $0x18] sm:$0xff]  ;;  %3203 = vmatprep.mubr.bf16.mxu1 %v1229_v25  ;;  %v1108_v30 = vld [vmem:[#allocation3 + $0x10] sm:$0xff]  ;;  %s5022_s0 = smov (!%p3004_p5), %s5021_s27 }
 0x175   : > { %3422 = vmatprep.subr.bf16.mxu0 %v4650_v12  ;;  %v1109_v31 = vld [vmem:[#allocation3 + $0x18] sm:$0xff]  ;;  %v3578_v41 = vld [vmem:[%s4577_s29] sm:$0xff]   ;;  %v3579_v48 = vld [vmem:[%s4577_s29 + $0x8] sm:$0xff]  }
 0x176   : > { %3424 = vmatpush3.bf16.msra.mxu0 %v4650_v12  ;;  %3192 = vmatpush3.bf16.msra.mxu1 %v3564_v18  ;;  %v1230_v33 = vpack.c.bf16 %v1109_v31, %v1108_v30  ;;  %v3577_v40 = vld [vmem:[%s4571_s24 + $0x38] sm:$0xff]   ;;  %v3582_v51 = vld [vmem:[%s4577_s29 + $0x20] sm:$0xff]   ;;  %v3583_v52 = vld [vmem:[%s4577_s29 + $0x28] sm:$0xff]  }
 0x177   : > { %3426 = vmatprep.subr.bf16.mxu0 %v4655_v15  ;;  %3193 = vmatprep.subr.bf16.mxu1 %v3565_v21  ;;  %v3581_v50 = vld [vmem:[%s4577_s29 + $0x18] sm:$0xff]   ;;  %v3584_v53 = vld [vmem:[%s4577_s29 + $0x30] sm:$0xff]   ;;  %v3594_v31 = vld [vmem:[%s4586_s6] sm:$0xff]  }
 0x178   : > { %v3585_v54 = vld [vmem:[%s4577_s29 + $0x38] sm:$0xff]   ;;  %v3587_v23 = vld [vmem:[%s4584_s4 + $0x8] sm:$0xff]  }
 0x179   : > { %v2948_v55 = vld [vmem:[%s1074_s15] ss:$0 sm:$0xff]  ;;  %s5017_s15 = sld [smem:[#allocation32_spill]]  ;;  %v3588_v25 = vld [vmem:[%s4584_s4 + $0x10] sm:$0xff]  }
 0x17a   : > { %3428 = vmatpush3.bf16.msra.mxu0 %v4655_v15  ;;  %3194 = vmatpush3.bf16.msra.mxu1 %v3565_v21  ;;  %v2957_v7 = vld [vmem:[%s5018_s17] ss:$0 sm:$0xff]  ;;  %s5029_s17 = smov (!%p3004_p5), %s5028_s2 }
 0x17b   : > { %3195 = vmatprep.subr.bf16.mxu1 %v3566_v26  ;;  %v3593_v30 = vld [vmem:[%s4584_s4 + $0x38] sm:$0xff]  }
 0x17d   : > { %3182 = vmatmul.mubr.msk.f32.vlgmr.msra.gmra.mrb[0].mxu0 %vm1114_vm0, %v1111_v19 }
 0x17e   : > { %3184 = vmatprep.mubr.msk.f32.mxu0 %vm1114_vm0, %v1112_v20  ;;  %3196 = vmatpush3.bf16.msra.mxu1 %v3566_v26  ;;  %v3586_v20 = vld [vmem:[%s4584_s4] sm:$0xff]   ;;  %v3589_v26 = vld [vmem:[%s4584_s4 + $0x18] sm:$0xff]  }
 0x17f   : > { %3197 = vmatprep.subr.bf16.mxu1 %v3567_v27  ;;  %v1583_v6 = vld [vmem:[%s5017_s15] sm:$0xff]  ;;  %v1584_v21 = vld [vmem:[%s5017_s15 + $0x8] sm:$0xff]  ;;  %v1585_v22 = vld [vmem:[%s5017_s15 + $0x10] sm:$0xff] }
 0x181   : > { %3185 = vmatmul.mubr.msk.f32.gmra.mrb[2].mxu0 %vm1114_vm0, %v1113_v24  ;;  %v1586_v24 = vld [vmem:[%s5017_s15 + $0x18] sm:$0xff] }
 0x182   : > { %3198 = vmatpush3.bf16.msra.mxu1 %v3567_v27  ;;  %3255 = vmatprep.mubr.msk.f32.mxu0 %vm1114_vm0, %v1583_v6  ;;  %v3590_v27 = vld [vmem:[%s4584_s4 + $0x20] sm:$0xff]  }
 0x183   : > { %3199 = vmatprep.subr.bf16.mxu1 %v3568_v28 }
 0x186   : > { %3200 = vmatpush3.bf16.msra.mxu1 %v3568_v28  ;;  %v3591_v28 = vld [vmem:[%s4584_s4 + $0x28] sm:$0xff]  }
 0x187   : > { %3201 = vmatprep.subr.bf16.mxu1 %v3569_v29 }
 0x18a   : > { %3202 = vmatpush3.bf16.msra.mxu1 %v3569_v29  ;;  %v3592_v29 = vld [vmem:[%s4584_s4 + $0x30] sm:$0xff]   ;;  %s5024_s4 = sld [smem:[#allocation47_spill]] (!%p3004_p5) }
 0x18b   : > { %3207 = vmatprep.subr.bf16.mxu1 %v3570_v32 }
 0x18d   : > { %3204 = vmatmul.mubr.bf16.vlgmr.msra.gmra.mrb[0].mxu1 %v1230_v33  ;;  %v3596_v33 = vld [vmem:[%s4586_s6 + $0x10] sm:$0xff]  }
 0x18e   : > { %3208 = vmatpush3.bf16.msra.mxu1 %v3570_v32  ;;  %v3595_v32 = vld [vmem:[%s4586_s6 + $0x8] sm:$0xff]  }
 0x18f   : > { %3209 = vmatprep.subr.bf16.mxu1 %v3571_v34 }
 0x192   : > { %3210 = vmatpush3.bf16.msra.mxu1 %v3571_v34  ;;  %v3597_v34 = vld [vmem:[%s4586_s6 + $0x18] sm:$0xff]  }
 0x193   : > { %3211 = vmatprep.subr.bf16.mxu1 %v3572_v35 }
 0x196   : > { %3212 = vmatpush3.bf16.msra.mxu1 %v3572_v35  ;;  %v3598_v35 = vld [vmem:[%s4586_s6 + $0x20] sm:$0xff]  }
 0x197   : > { %3213 = vmatprep.subr.bf16.mxu1 %v3573_v36 }
 0x19a   : > { %3214 = vmatpush3.bf16.msra.mxu1 %v3573_v36  ;;  %v3599_v36 = vld [vmem:[%s4586_s6 + $0x28] sm:$0xff]  }
 0x19b   : > { %3215 = vmatprep.subr.bf16.mxu1 %v3574_v37 }
 0x19e   : > { %3216 = vmatpush3.bf16.msra.mxu1 %v3574_v37  ;;  %v3600_v37 = vld [vmem:[%s4586_s6 + $0x30] sm:$0xff]  }
 0x19f   : > { %3217 = vmatprep.subr.bf16.mxu1 %v3575_v38 }
 0x1a2   : > { %3218 = vmatpush3.bf16.msra.mxu1 %v3575_v38  ;;  %v3601_v38 = vld [vmem:[%s4586_s6 + $0x38] sm:$0xff]  }
 0x1a3   : > { %3219 = vmatprep.subr.bf16.mxu1 %v3576_v39 }
 0x1a6   : > { %3220 = vmatpush3.bf16.msra.mxu1 %v3576_v39  ;;  %v3602_v39 = vld [vmem:[%s4592_s19] sm:$0xff]  }
 0x1a7   : > { %3221 = vmatprep.subr.bf16.mxu1 %v3577_v40 }
 0x1aa   : > { %3222 = vmatpush3.bf16.msra.mxu1 %v3577_v40  ;;  %v3610_v40 = vld [vmem:[%s4594_s26] sm:$0xff]  }
 0x1ab   : > { %3227 = vmatprep.subr.bf16.mxu1 %v3578_v41 }
 0x250   : > { %v3183_v42 = vpop.f32.mrb[0].mxu0 }
 0x251   : > { %v1193_v43 = vpop.f32.mrb[1].mxu0 }
 0x252   : > { %v1354_v44 = vpack.c.bf16 %v3183_v42, %v1193_v43  ;;  %v3612_v42 = vld [vmem:[%s4594_s26 + $0x10] sm:$0xff]   ;;  %v3613_v43 = vld [vmem:[%s4594_s26 + $0x18] sm:$0xff]  }
 0x254   : > { %v3186_v45 = vpop.f32.mrb[2].mxu0  ;;  %3223 = vmatprep.mubr.bf16.mxu1 %v1354_v44  ;;  %v3614_v44 = vld [vmem:[%s4594_s26 + $0x20] sm:$0xff]  }
 0x255   : > { %v1203_v46 = vpop.f32.mrb[3].mxu0 }
 0x256   : > { %v1355_v47 = vpack.c.bf16 %v3186_v45, %v1203_v46  ;;  %v3615_v45 = vld [vmem:[%s4594_s26 + $0x28] sm:$0xff]  }
 0x258   : > { %3224 = vmatmul.mubr.bf16.vlgmr.msra.gmra.mrb[0].mxu1 %v1355_v47 }
 0x259   : > { %3228 = vmatpush3.bf16.msra.mxu1 %v3578_v41  ;;  %v3611_v41 = vld [vmem:[%s4594_s26 + $0x8] sm:$0xff]  }
 0x25a   : > { %3229 = vmatprep.subr.bf16.mxu1 %v3579_v48 }
 0x25d   : > { %3230 = vmatpush3.bf16.msra.mxu1 %v3579_v48 }
 0x25e   : > { %3231 = vmatprep.subr.bf16.mxu1 %v3580_v49 }
 0x261   : > { %3232 = vmatpush3.bf16.msra.mxu1 %v3580_v49 }
 0x262   : > { %3233 = vmatprep.subr.bf16.mxu1 %v3581_v50 }
 0x265   : > { %3234 = vmatpush3.bf16.msra.mxu1 %v3581_v50 }
 0x266   : > { %3235 = vmatprep.subr.bf16.mxu1 %v3582_v51 }
 0x269   : > { %3236 = vmatpush3.bf16.msra.mxu1 %v3582_v51 }
 0x26a   : > { %3237 = vmatprep.subr.bf16.mxu1 %v3583_v52 }
 0x26d   : > { %3238 = vmatpush3.bf16.msra.mxu1 %v3583_v52  ;;  %v3603_v52 = vld [vmem:[%s4592_s19 + $0x8] sm:$0xff]  }
 0x26e   : > { %3239 = vmatprep.subr.bf16.mxu1 %v3584_v53 }
 0x271   : > { %3240 = vmatpush3.bf16.msra.mxu1 %v3584_v53  ;;  %v3604_v53 = vld [vmem:[%s4592_s19 + $0x10] sm:$0xff]  }
 0x272   : > { %3241 = vmatprep.subr.bf16.mxu1 %v3585_v54 }
 0x275   : > { %3242 = vmatpush3.bf16.msra.mxu1 %v3585_v54  ;;  %v3605_v54 = vld [vmem:[%s4592_s19 + $0x18] sm:$0xff]  }
 0x276   : > { %3321 = vmatprep.subr.bf16.mxu1 %v3610_v40 }
 0x32b   : > { %v3225_v56 = vpop.f32.mrb[0].mxu1 }
 0x32c   : > { %v3437_v57 = vadd.f32 %v3225_v56, %v2948_v55  ;;  %v1438_v58 = vpop.f32.mrb[1].mxu1  ;;  %v3607_v56 = vld [vmem:[%s4592_s19 + $0x28] sm:$0xff]  }
 0x32d   : > { %v3438_v59 = vadd.f32 %v2948_v55, %v1438_v58  ;;  %v3226_v60 = vpop.f32.mrb[2].mxu1  ;;  %v3616_v58 = vld [vmem:[%s4594_s26 + $0x30] sm:$0xff]  }
 0x32e   : > { %v3439_v61 = vadd.f32 %v3226_v60, %v2948_v55  ;;  %v1441_v62 = vpop.f32.mrb[3].mxu1  ;;  %v1459_v0 = vmax.f32 %v3437_v57, 0.0  ;;  %v3608_v57 = vld [vmem:[%s4592_s19 + $0x30] sm:$0xff]   ;;  %v2978_v60 = vld [vmem:[%s1077_s8] ss:$0 sm:$0xff] }
 0x32f   : > { %v3440_v63 = vadd.f32 %v2948_v55, %v1441_v62  ;;  %v1457_v2 = vmax.f32 %v3438_v59, 0.0  ;;  %v3606_v55 = vld [vmem:[%s4592_s19 + $0x20] sm:$0xff]   ;;  %v3617_v59 = vld [vmem:[%s4594_s26 + $0x38] sm:$0xff]   ;;  %s5023_s26 = sld [smem:[#allocation46_spill]] (!%p3004_p5) }
 0x330   : > { %v1460_v1 = vmax.f32 %v3439_v61, 0.0 }
 0x331   : > { %v1458_v3 = vmax.f32 %v3440_v63, 0.0 }
 0x332   : > { %v1478_v4 = vpack.c.bf16 %v1460_v1, %v1459_v0 }
 0x333   : > { %v1477_v5 = vpack.c.bf16 %v1458_v3, %v1457_v2 }
 0x335   : > { %3243 = vmatprep.mubr.bf16.mxu1 %v1477_v5 }
 0x336   : > { %3244 = vmatmul.mubr.bf16.vlgmr.msra.gmra.mrb[4].mxu1 %v1478_v4 }
 0x337   : > { %3322 = vmatpush3.bf16.msra.mxu1 %v3610_v40  ;;  %v3629_v40 = vld [vmem:[%s5023_s26 + $0x18] sm:$0xff] (!%p3004_p5)  }
 0x338   : > { %3323 = vmatprep.subr.bf16.mxu1 %v3611_v41 }
 0x33b   : > { %3324 = vmatpush3.bf16.msra.mxu1 %v3611_v41  ;;  %v3630_v41 = vld [vmem:[%s5023_s26 + $0x20] sm:$0xff] (!%p3004_p5)  }
 0x33c   : > { %3325 = vmatprep.subr.bf16.mxu1 %v3612_v42 }
 0x33f   : > { %3326 = vmatpush3.bf16.msra.mxu1 %v3612_v42  ;;  %v3631_v42 = vld [vmem:[%s5023_s26 + $0x28] sm:$0xff] (!%p3004_p5)  }
 0x340   : > { %3327 = vmatprep.subr.bf16.mxu1 %v3613_v43 }
 0x343   : > { %3328 = vmatpush3.bf16.msra.mxu1 %v3613_v43  ;;  %v3632_v43 = vld [vmem:[%s5023_s26 + $0x30] sm:$0xff] (!%p3004_p5)  }
 0x344   : > { %3329 = vmatprep.subr.bf16.mxu1 %v3614_v44 }
 0x347   : > { %3330 = vmatpush3.bf16.msra.mxu1 %v3614_v44  ;;  %v3633_v44 = vld [vmem:[%s5023_s26 + $0x38] sm:$0xff] (!%p3004_p5)  }
 0x348   : > { %3331 = vmatprep.subr.bf16.mxu1 %v3615_v45 }
 0x34b   : > { %3332 = vmatpush3.bf16.msra.mxu1 %v3615_v45 }
 0x34c   : > { %3333 = vmatprep.subr.bf16.mxu1 %v3616_v58 }
 0x34f   : > { %3334 = vmatpush3.bf16.msra.mxu1 %v3616_v58  ;;  %v3643_v58 = vld [vmem:[#allocation19 + $0x8] sm:$0xff] (!%p3004_p5)  }
 0x350   : > { %3335 = vmatprep.subr.bf16.mxu1 %v3617_v59 }
 0x353   : > { %3336 = vmatpush3.bf16.msra.mxu1 %v3617_v59  ;;  %v3644_v59 = vld [vmem:[#allocation19 + $0x10] sm:$0xff] (!%p3004_p5)  }
 0x409   : > { %v3245_v8 = vpop.f32.mrb[4].mxu1 }
 0x40a   : > { %v1577_v9 = vadd.f32 %v3245_v8, %v2957_v7  ;;  %v1568_v10 = vpop.f32.mrb[5].mxu1 }
 0x40b   : > { %v1569_v11 = vadd.f32 %v2957_v7, %v1568_v10  ;;  %v3246_v13 = vpop.f32.mrb[6].mxu1  ;;  %v2995_v10 = vld [vmem:[%s1080_s14] ss:$0 sm:$0xff] }
 0x40c   : > { %2178 = vst [vmem:[#allocation3 + $0x10] sm:$0xff] %v1577_v9  ;;  %v1580_v14 = vadd.f32 %v3246_v13, %v2957_v7  ;;  %v1571_v16 = vpop.f32.mrb[7].mxu1 }
 0x40d   : > { %2176 = vst [vmem:[#allocation3] sm:$0xff] %v1569_v11  ;;  %v1572_v17 = vadd.f32 %v2957_v7, %v1571_v16 }
 0x40e   : > { %v3433_v18 = vpack.c.bf16 %v1580_v14, %v1577_v9  ;;  %2179 = vst [vmem:[#allocation3 + $0x18] sm:$0xff] %v1580_v14 }
 0x40f   : > { %v3429_v19 = vpack.c.bf16 %v1572_v17, %v1569_v11  ;;  %2177 = vst [vmem:[#allocation3 + $0x8] sm:$0xff] %v1572_v17 }
 0x411   : > { %3430 = vmatprep.subr.bf16.mxu0 %v3429_v19 }
 0x412   : > { %3432 = vmatpush3.bf16.msra.mxu0 %v3429_v19 }
 0x413   : > { %3434 = vmatprep.subr.bf16.mxu0 %v3433_v18 }
 0x416   : > { %3436 = vmatpush3.bf16.msra.mxu0 %v3433_v18 }
 0x417   : > { %3261 = vmatprep.subr.bf16.mxu0 %v3586_v20 }
 0x419   : > { %3256 = vmatmul.mubr.msk.f32.vlgmr.msra.gmra.mrb[4].mxu0 %vm1114_vm0, %v1584_v21  ;;  %v3618_v21 = vld [vmem:[%s5021_s27] sm:$0xff] (!%p3004_p5)  }
 0x41a   : > { %3258 = vmatprep.mubr.msk.f32.mxu0 %vm1114_vm0, %v1585_v22  ;;  %3262 = vmatpush3.bf16.msra.mxu0 %v3586_v20  ;;  %v4018_v22 = vmov (!%p3004_p5), 0.0  }
 0x41b   : > { %3263 = vmatprep.subr.bf16.mxu0 %v3587_v23  ;;  %3381 = vmatprep.subr.bf16.mxu1 (!%p3004_p5), %v4018_v22 }
 0x41d   : > { %3259 = vmatmul.mubr.msk.f32.gmra.mrb[6].mxu0 %vm1114_vm0, %v1586_v24  ;;  %v3620_v24 = vld [vmem:[%s5022_s0 + $0x10] sm:$0xff] (!%p3004_p5)  }
 0x41e   : > { %3264 = vmatpush3.bf16.msra.mxu0 %v3587_v23  ;;  %3277 = vmatprep.mubr.bf16.mxu0 %v4650_v12  ;;  %v3619_v23 = vld [vmem:[%s5022_s0 + $0x8] sm:$0xff] (!%p3004_p5)  }
 0x41f   : > { %3265 = vmatprep.subr.bf16.mxu0 %v3588_v25 }
 0x422   : > { %3266 = vmatpush3.bf16.msra.mxu0 %v3588_v25  ;;  %v3621_v25 = vld [vmem:[%s5022_s0 + $0x18] sm:$0xff] (!%p3004_p5)  }
 0x423   : > { %3267 = vmatprep.subr.bf16.mxu0 %v3589_v26 }
 0x426   : > { %3268 = vmatpush3.bf16.msra.mxu0 %v3589_v26  ;;  %v3622_v26 = vld [vmem:[%s5022_s0 + $0x20] sm:$0xff] (!%p3004_p5)  }
 0x427   : > { %3269 = vmatprep.subr.bf16.mxu0 %v3590_v27 }
 0x42a   : > { %3270 = vmatpush3.bf16.msra.mxu0 %v3590_v27  ;;  %v3634_v27 = vld [vmem:[#allocation18] sm:$0xff] (!%p3004_p5)  }
 0x42b   : > { %3271 = vmatprep.subr.bf16.mxu0 %v3591_v28 }
 0x42e   : > { %3272 = vmatpush3.bf16.msra.mxu0 %v3591_v28  ;;  %v3623_v28 = vld [vmem:[%s5022_s0 + $0x28] sm:$0xff] (!%p3004_p5)  }
 0x42f   : > { %3273 = vmatprep.subr.bf16.mxu0 %v3592_v29 }
 0x432   : > { %3274 = vmatpush3.bf16.msra.mxu0 %v3592_v29  ;;  %v3635_v29 = vld [vmem:[#allocation18 + $0x8] sm:$0xff] (!%p3004_p5)  }
 0x433   : > { %3275 = vmatprep.subr.bf16.mxu0 %v3593_v30 }
 0x436   : > { %3276 = vmatpush3.bf16.msra.mxu0 %v3593_v30  ;;  %v3624_v30 = vld [vmem:[%s5022_s0 + $0x30] sm:$0xff] (!%p3004_p5)  }
 0x437   : > { %3281 = vmatprep.subr.bf16.mxu0 %v3594_v31 }
 0x439   : > { %3278 = vmatmul.mubr.bf16.vlgmr.msra.gmra.mrb[8].mxu0 %v4655_v15 }
 0x43a   : > { %3282 = vmatpush3.bf16.msra.mxu0 %v3594_v31  ;;  %v3636_v31 = vld [vmem:[#allocation18 + $0x10] sm:$0xff] (!%p3004_p5)  }
 0x43b   : > { %3283 = vmatprep.subr.bf16.mxu0 %v3595_v32 }
 0x43e   : > { %3284 = vmatpush3.bf16.msra.mxu0 %v3595_v32  ;;  %v3625_v32 = vld [vmem:[%s5022_s0 + $0x38] sm:$0xff] (!%p3004_p5)  }
 0x43f   : > { %3285 = vmatprep.subr.bf16.mxu0 %v3596_v33 }
 0x442   : > { %3286 = vmatpush3.bf16.msra.mxu0 %v3596_v33  ;;  %v3637_v33 = vld [vmem:[#allocation18 + $0x18] sm:$0xff] (!%p3004_p5)  }
 0x443   : > { %3287 = vmatprep.subr.bf16.mxu0 %v3597_v34 }
 0x446   : > { %3288 = vmatpush3.bf16.msra.mxu0 %v3597_v34 }
 0x447   : > { %3289 = vmatprep.subr.bf16.mxu0 %v3598_v35 }
 0x44a   : > { %3290 = vmatpush3.bf16.msra.mxu0 %v3598_v35  ;;  %v3626_v35 = vld [vmem:[%s5023_s26] sm:$0xff] (!%p3004_p5)  }
 0x44b   : > { %3291 = vmatprep.subr.bf16.mxu0 %v3599_v36 }
 0x44e   : > { %3292 = vmatpush3.bf16.msra.mxu0 %v3599_v36  ;;  %v3638_v36 = vld [vmem:[#allocation18 + $0x20] sm:$0xff] (!%p3004_p5)  }
 0x44f   : > { %3293 = vmatprep.subr.bf16.mxu0 %v3600_v37 }
 0x452   : > { %3294 = vmatpush3.bf16.msra.mxu0 %v3600_v37  ;;  %v3627_v37 = vld [vmem:[%s5023_s26 + $0x8] sm:$0xff] (!%p3004_p5)  }
 0x453   : > { %3295 = vmatprep.subr.bf16.mxu0 %v3601_v38 }
 0x456   : > { %3296 = vmatpush3.bf16.msra.mxu0 %v3601_v38  ;;  %v3639_v38 = vld [vmem:[#allocation18 + $0x28] sm:$0xff] (!%p3004_p5)  }
 0x457   : > { %3301 = vmatprep.subr.bf16.mxu0 %v3602_v39 }
 0x4ec   : > { %v3257_v46 = vpop.f32.mrb[4].mxu0 }
 0x4ed   : > { %v1665_v47 = vpop.f32.mrb[5].mxu0 }
 0x4ee   : > { %v1826_v48 = vpack.c.bf16 %v3257_v46, %v1665_v47  ;;  %v3640_v46 = vld [vmem:[#allocation18 + $0x30] sm:$0xff] (!%p3004_p5)   ;;  %v3641_v47 = vld [vmem:[#allocation18 + $0x38] sm:$0xff] (!%p3004_p5)  }
 0x4f0   : > { %v3260_v49 = vpop.f32.mrb[6].mxu0  ;;  %3297 = vmatprep.mubr.bf16.mxu0 %v1826_v48  ;;  %v3013_v48 = vld [vmem:[%s5024_s4] ss:$0 sm:$0xff] (!%p3004_p5) }
 0x4f1   : > { %v1675_v50 = vpop.f32.mrb[7].mxu0 }
 0x4f2   : > { %v1827_v51 = vpack.c.bf16 %v3260_v49, %v1675_v50 }
 0x4f4   : > { %3298 = vmatmul.mubr.bf16.vlgmr.msra.gmra.mrb[8].mxu0 %v1827_v51 }
 0x4f5   : > { %3302 = vmatpush3.bf16.msra.mxu0 %v3602_v39  ;;  %3317 = vmatprep.mubr.bf16.mxu0 %v4655_v15  ;;  %v3609_v15 = vld [vmem:[%s4592_s19 + $0x38] sm:$0xff]   ;;  %v3628_v39 = vld [vmem:[%s5023_s26 + $0x10] sm:$0xff] (!%p3004_p5)   ;;  %s5025_s19 = sld [smem:[#allocation49_spill]] (!%p3004_p5) }
 0x4f6   : > { %3303 = vmatprep.subr.bf16.mxu0 %v3603_v52 }
 0x4f9   : > { %3304 = vmatpush3.bf16.msra.mxu0 %v3603_v52 }
 0x4fa   : > { %3305 = vmatprep.subr.bf16.mxu0 %v3604_v53 }
 0x4fd   : > { %3306 = vmatpush3.bf16.msra.mxu0 %v3604_v53 }
 0x4fe   : > { %3307 = vmatprep.subr.bf16.mxu0 %v3605_v54 }
 0x501   : > { %3308 = vmatpush3.bf16.msra.mxu0 %v3605_v54 }
 0x502   : > { %3309 = vmatprep.subr.bf16.mxu0 %v3606_v55 }
 0x505   : > { %3310 = vmatpush3.bf16.msra.mxu0 %v3606_v55 }
 0x506   : > { %3311 = vmatprep.subr.bf16.mxu0 %v3607_v56 }
 0x509   : > { %3312 = vmatpush3.bf16.msra.mxu0 %v3607_v56 }
 0x50a   : > { %3313 = vmatprep.subr.bf16.mxu0 %v3608_v57 }
 0x50d   : > { %3314 = vmatpush3.bf16.msra.mxu0 %v3608_v57  ;;  %v3642_v57 = vld [vmem:[#allocation19] sm:$0xff] (!%p3004_p5)  }
 0x50e   : > { %3315 = vmatprep.subr.bf16.mxu0 %v3609_v15 }
 0x511   : > { %3316 = vmatpush3.bf16.msra.mxu0 %v3609_v15 }
 0x512   : > { %3341 = vmatprep.subr.bf16.mxu0 (!%p3004_p5), %v4018_v22 }
 0x514   : > { %3318 = vmatmul.mubr.bf16.vlgmr.msra.gmra.mrb[8].mxu0 %v4650_v12 }
 0x515   : > { %3342 = vmatpush3.bf16.msra.mxu0 (!%p3004_p5), %v3618_v21  ;;  %3357 = vmatprep.mubr.msk.bf16.mxu0 (!%p3004_p5), %vm4019_vm1, %v4018_v22 }
 0x516   : > { %3343 = vmatprep.subr.bf16.mxu0 (!%p3004_p5), %v4018_v22 }
 0x519   : > { %3344 = vmatpush3.bf16.msra.mxu0 (!%p3004_p5), %v3619_v23 }
 0x51a   : > { %3345 = vmatprep.subr.bf16.mxu0 (!%p3004_p5), %v4018_v22 }
 0x51d   : > { %3346 = vmatpush3.bf16.msra.mxu0 (!%p3004_p5), %v3620_v24  ;;  %v3041_v24 = vld [vmem:[#allocation4] ss:$0 sm:$0xff] (!%p3004_p5) }
 0x51e   : > { %3347 = vmatprep.subr.bf16.mxu0 (!%p3004_p5), %v4018_v22 }
 0x521   : > { %3348 = vmatpush3.bf16.msra.mxu0 (!%p3004_p5), %v3621_v25 }
 0x522   : > { %3349 = vmatprep.subr.bf16.mxu0 (!%p3004_p5), %v4018_v22 }
 0x525   : > { %3350 = vmatpush3.bf16.msra.mxu0 (!%p3004_p5), %v3622_v26 }
 0x526   : > { %3351 = vmatprep.subr.bf16.mxu0 (!%p3004_p5), %v4018_v22 }
 0x529   : > { %3352 = vmatpush3.bf16.msra.mxu0 (!%p3004_p5), %v3623_v28 }
 0x52a   : > { %3353 = vmatprep.subr.bf16.mxu0 (!%p3004_p5), %v4018_v22 }
 0x52d   : > { %3354 = vmatpush3.bf16.msra.mxu0 (!%p3004_p5), %v3624_v30 }
 0x52e   : > { %3355 = vmatprep.subr.bf16.mxu0 (!%p3004_p5), %v4018_v22 }
 0x531   : > { %3356 = vmatpush3.bf16.msra.mxu0 (!%p3004_p5), %v3625_v32 }
 0x532   : > { %3361 = vmatprep.subr.bf16.mxu0 (!%p3004_p5), %v4018_v22 }
 0x5e7   : > { %v3319_v61 = vpop.f32.mrb[8].mxu0 }
 0x5e8   : > { %v3441_v62 = vadd.f32 %v3319_v61, %v2978_v60  ;;  %v2027_v63 = vpop.f32.mrb[9].mxu0  ;;  %v3646_v61 = vld [vmem:[#allocation19 + $0x20] sm:$0xff] (!%p3004_p5)  }
 0x5e9   : > { %v3442_v0 = vadd.f32 %v2978_v60, %v2027_v63  ;;  %v3320_v1 = vpop.f32.mrb[10].mxu0  ;;  %v3648_v63 = vld [vmem:[#allocation19 + $0x30] sm:$0xff] (!%p3004_p5)  }
 0x5ea   : > { %v3443_v2 = vadd.f32 %v3320_v1, %v2978_v60  ;;  %v2030_v3 = vpop.f32.mrb[11].mxu0  ;;  %v2048_v4 = vmax.f32 %v3441_v62, 0.0  ;;  %v3647_v62 = vld [vmem:[#allocation19 + $0x28] sm:$0xff] (!%p3004_p5)   ;;  %v3022_v1 = vld [vmem:[%s5025_s19] ss:$0 sm:$0xff] (!%p3004_p5) }
 0x5eb   : > { %v3444_v12 = vadd.f32 %v2978_v60, %v2030_v3  ;;  %v2046_v6 = vmax.f32 %v3442_v0, 0.0  ;;  %v3645_v60 = vld [vmem:[#allocation19 + $0x18] sm:$0xff] (!%p3004_p5)  }
 0x5ec   : > { %v2049_v5 = vmax.f32 %v3443_v2, 0.0  ;;  %v3649_v0 = vld [vmem:[#allocation19 + $0x38] sm:$0xff] (!%p3004_p5)  }
 0x5ed   : > { %v2047_v7 = vmax.f32 %v3444_v12, 0.0 }
 0x5ee   : > { %v2067_v8 = vpack.c.bf16 %v2049_v5, %v2048_v4 }
 0x5ef   : > { %v2066_v9 = vpack.c.bf16 %v2047_v7, %v2046_v6 }
 0x5f1   : > { %3337 = vmatprep.mubr.bf16.mxu1 %v2066_v9 }
 0x5f2   : > { %3338 = vmatmul.mubr.bf16.vlgmr.msra.gmra.mrb[8].mxu1 %v2067_v8 }
 0x5f3   : > { %3397 = vmatprep.mubr.msk.bf16.mxu1 (!%p3004_p5), %vm4019_vm1, %v4018_v22  ;;  %3382 = vmatpush3.bf16.msra.mxu1 (!%p3004_p5), %v3634_v27 }
 0x5f4   : > { %3383 = vmatprep.subr.bf16.mxu1 (!%p3004_p5), %v4018_v22 }
 0x5f7   : > { %3384 = vmatpush3.bf16.msra.mxu1 (!%p3004_p5), %v3635_v29 }
 0x5f8   : > { %3385 = vmatprep.subr.bf16.mxu1 (!%p3004_p5), %v4018_v22 }
 0x5fb   : > { %3386 = vmatpush3.bf16.msra.mxu1 (!%p3004_p5), %v3636_v31 }
 0x5fc   : > { %3387 = vmatprep.subr.bf16.mxu1 (!%p3004_p5), %v4018_v22 }
 0x5ff   : > { %3388 = vmatpush3.bf16.msra.mxu1 (!%p3004_p5), %v3637_v33 }
 0x600   : > { %3389 = vmatprep.subr.bf16.mxu1 (!%p3004_p5), %v4018_v22 }
 0x603   : > { %3390 = vmatpush3.bf16.msra.mxu1 (!%p3004_p5), %v3638_v36 }
 0x604   : > { %3391 = vmatprep.subr.bf16.mxu1 (!%p3004_p5), %v4018_v22 }
 0x607   : > { %3392 = vmatpush3.bf16.msra.mxu1 (!%p3004_p5), %v3639_v38 }
 0x608   : > { %3393 = vmatprep.subr.bf16.mxu1 (!%p3004_p5), %v4018_v22 }
 0x60b   : > { %3394 = vmatpush3.bf16.msra.mxu1 (!%p3004_p5), %v3640_v46 }
 0x60c   : > { %3395 = vmatprep.subr.bf16.mxu1 (!%p3004_p5), %v4018_v22 }
 0x60f   : > { %3396 = vmatpush3.bf16.msra.mxu1 (!%p3004_p5), %v3641_v47 }
 0x610   : > { %3401 = vmatprep.subr.bf16.mxu1 (!%p3004_p5), %v4018_v22 }
 0x6c5   : > { %v3339_v11 = vpop.f32.mrb[8].mxu1  ;;  %2183 = sbr.rel (%p3004_p5) target bundleno = 2580 (0xa14), region = 164 }
 0x6c6   : > { %v4767_v13 = vadd.f32 %v3339_v11, %v2995_v10  ;;  %v2157_v14 = vpop.f32.mrb[9].mxu1 }
 0x6c7   : > { %v2158_v16 = vadd.f32 %v2995_v10, %v2157_v14  ;;  %v3340_v17 = vpop.f32.mrb[10].mxu1 }
 0x6c8   : > { %2174 = vst [vmem:[#allocation2 + $0x10] sm:$0xff] %v4767_v13  ;;  %v4770_v18 = vadd.f32 %v3340_v17, %v2995_v10  ;;  %v2160_v19 = vpop.f32.mrb[11].mxu1  ;;  %v3040_v17 = vld [vmem:[%s5027_s25] ss:$0 sm:$0xff] (!%p3004_p5) }
 0x6c9   : > { %2172 = vst [vmem:[#allocation2] sm:$0xff] %v2158_v16  ;;  %v2161_v20 = vadd.f32 %v2995_v10, %v2160_v19  ;;  %v3031_v10 = vld [vmem:[%s5026_s7] ss:$0 sm:$0xff] (!%p3004_p5) }
 0x6ca   : > { %2175 = vst [vmem:[#allocation2 + $0x18] sm:$0xff] %v4770_v18  ;;  %v2315_v45 = vpack.c.bf16 (!%p3004_p5), %v4770_v18, %v4767_v13 }
 0x6cb   : > { %2173 = vst [vmem:[#allocation2 + $0x8] sm:$0xff] %v2161_v20  ;;  %v2201_v34 = vpack.c.bf16 (!%p3004_p5), %v2161_v20, %v2158_v16 }
 0x6cd   : > { %3358 = vmatmul.mubr.bf16.vlgmr.msra.gmra.mrb[0].mxu0 %v2201_v34 }
 0x6ce   : > { %3362 = vmatpush3.bf16.msra.mxu0 %v3626_v35  ;;  %3377 = vmatprep.mubr.msk.bf16.mxu0 %vm4019_vm1, %v4018_v22 }
 0x6cf   : > { %3363 = vmatprep.subr.bf16.mxu0 %v4018_v22 }
 0x6d2   : > { %3364 = vmatpush3.bf16.msra.mxu0 %v3627_v37 }
 0x6d3   : > { %3365 = vmatprep.subr.bf16.mxu0 %v4018_v22 }
 0x6d6   : > { %3366 = vmatpush3.bf16.msra.mxu0 %v3628_v39 }
 0x6d7   : > { %3367 = vmatprep.subr.bf16.mxu0 %v4018_v22 }
 0x6da   : > { %3368 = vmatpush3.bf16.msra.mxu0 %v3629_v40 }
 0x6db   : > { %3369 = vmatprep.subr.bf16.mxu0 %v4018_v22 }
 0x6de   : > { %3370 = vmatpush3.bf16.msra.mxu0 %v3630_v41 }
 0x6df   : > { %3371 = vmatprep.subr.bf16.mxu0 %v4018_v22 }
 0x6e2   : > { %3372 = vmatpush3.bf16.msra.mxu0 %v3631_v42 }
 0x6e3   : > { %3373 = vmatprep.subr.bf16.mxu0 %v4018_v22 }
 0x6e6   : > { %3374 = vmatpush3.bf16.msra.mxu0 %v3632_v43 }
 0x6e7   : > { %3375 = vmatprep.subr.bf16.mxu0 %v4018_v22 }
 0x6ea   : > { %3376 = vmatpush3.bf16.msra.mxu0 %v3633_v44 }
 0x6ed   : > { %3378 = vmatmul.mubr.bf16.vlgmr.msra.gmra.mrb[0].mxu0 %v2315_v45 }
 0x7c0   : > { %v2398_v49 = vpop.f32.mrb[0].mxu0 }
 0x7c1   : > { %v3457_v50 = vadd.f32 %v3013_v48, %v2398_v49  ;;  %v3379_v51 = vpop.f32.mrb[1].mxu0 }
 0x7c2   : > { %v2401_v52 = vpop.f32.mrb[2].mxu0 }
 0x7c3   : > { %v3458_v53 = vadd.f32 %v3013_v48, %v2401_v52  ;;  %v3380_v54 = vpop.f32.mrb[3].mxu0  ;;  %v2407_v55 = vmax.f32 %v3457_v50, 0.0 }
 0x7c5   : > { %v2408_v56 = vmax.f32 %v3458_v53, 0.0 }
 0x7c7   : > { %v2425_v15 = vpack.c.bf16 %v2408_v56, %v2407_v55 }
 0x7c9   : > { %3398 = vmatmul.mubr.bf16.vlgmr.msra.gmra.mrb[0].mxu1 %v2425_v15 }
 0x7ca   : > { %3402 = vmatpush3.bf16.msra.mxu1 %v3642_v57  ;;  %3417 = vmatprep.mubr.msk.bf16.mxu1 %vm4019_vm1, %v4018_v22 }
 0x7cb   : > { %3403 = vmatprep.subr.bf16.mxu1 %v4018_v22 }
 0x7ce   : > { %3404 = vmatpush3.bf16.msra.mxu1 %v3643_v58 }
 0x7cf   : > { %3405 = vmatprep.subr.bf16.mxu1 %v4018_v22 }
 0x7d2   : > { %3406 = vmatpush3.bf16.msra.mxu1 %v3644_v59 }
 0x7d3   : > { %3407 = vmatprep.subr.bf16.mxu1 %v4018_v22 }
 0x7d6   : > { %3408 = vmatpush3.bf16.msra.mxu1 %v3645_v60 }
 0x7d7   : > { %3409 = vmatprep.subr.bf16.mxu1 %v4018_v22 }
 0x7da   : > { %3410 = vmatpush3.bf16.msra.mxu1 %v3646_v61 }
 0x7db   : > { %3411 = vmatprep.subr.bf16.mxu1 %v4018_v22 }
 0x7de   : > { %3412 = vmatpush3.bf16.msra.mxu1 %v3647_v62 }
 0x7df   : > { %3413 = vmatprep.subr.bf16.mxu1 %v4018_v22 }
 0x7e2   : > { %3414 = vmatpush3.bf16.msra.mxu1 %v3648_v63 }
 0x7e3   : > { %3415 = vmatprep.subr.bf16.mxu1 %v4018_v22 }
 0x7e6   : > { %3416 = vmatpush3.bf16.msra.mxu1 %v3649_v0 }
 0x89c   : > { %v2515_v2 = vpop.f32.mrb[0].mxu1 }
 0x89d   : > { %v2516_v3 = vadd.f32 %v3022_v1, %v2515_v2  ;;  %v3399_v12 = vpop.f32.mrb[1].mxu1 }
 0x89e   : > { %v2518_v4 = vpop.f32.mrb[2].mxu1 }
 0x89f   : > { %v2519_v5 = vadd.f32 %v3022_v1, %v2518_v4  ;;  %v3400_v6 = vpop.f32.mrb[3].mxu1  ;;  %v2522_v7 = vmax.f32 %v2516_v3, 0.0 }
 0x8a1   : > { %v2523_v8 = vmax.f32 %v2519_v5, 0.0 }
 0x8a3   : > { %v2540_v9 = vpack.c.bf16 %v2523_v8, %v2522_v7 }
 0x8a5   : > { %3418 = vmatmul.mubr.bf16.vlgmr.msra.gmra.mrb[4].mxu1 %v2540_v9 }
 0x978   : > { %v2630_v11 = vpop.f32.mrb[4].mxu1 }
 0x979   : > { %v2631_v13 = vadd.f32 %v3031_v10, %v2630_v11  ;;  %v3419_v14 = vpop.f32.mrb[5].mxu1 }
 0x97a   : > { %v2633_v16 = vpop.f32.mrb[6].mxu1 }
 0x97b   : > { %v2637_v18 = vmax.f32 %v2631_v13, 0.0  ;;  %v2634_v19 = vadd.f32 %v3031_v10, %v2633_v16  ;;  %v3420_v20 = vpop.f32.mrb[7].mxu1 }
 0x97d   : > { %v2638_v21 = vmax.f32 %v2634_v19, 0.0  ;;  %v2646_v22 = vmul.f32 %v3040_v17, %v2637_v18 }
 0x97f   : > { %2648 = vadd.xlane.f32.xlu0 %v2646_v22  ;;  %v2647_v23 = vmul.f32 %v3040_v17, %v2638_v21 }
 0x983   : > { %2650 = vadd.xlane.f32.xlu0 %v2647_v23 }
 0xa0c   : > { %v2649_v25 = vpop.xlane.xlu0 %2648 }
 0xa0d   : > { %v2659_v26 = vadd.f32 %v3041_v24, %v2649_v25 }
 0xa0f   : > { %2662 = vst.msk [vmem:[%s5028_s2] sm:$0xff] %vm2661_vm2, %v2659_v26 }
 0xa10   : > { %v2651_v27 = vpop.xlane.xlu0 %2650 }
 0xa11   : > { %v2660_v28 = vadd.f32 %v3041_v24, %v2651_v27 }
 0xa13   : > { %2663 = vst.msk [vmem:[%s5029_s17 + $0x8] sm:$0xff] %vm2661_vm2, %v2660_v28 }
 0xa14 PF: > { %s5030_s2 = sld [smem:[#allocation29_spill]]  ;;  %s5031_s22 = sld [smem:[#allocation28_spill]] }
 0xa15   : > { %s5032_s6 = sld [smem:[#allocation30_spill]]  ;;  %s5033_s27 = smov %s3996_s28 }
 0xa1a   : > { %p49_p3 = scmp.ge.s32.totalorder %s5030_s2, 6   ;;  %s5034_s28 = smov %s5031_s22 }
 0xa1c   :  { %51 = sbr.rel (!%p49_p3) target bundleno = 35 (0x23), region = 262 }
 0xa23   :  { %2675 = vsyncpa [#allocation6], 1 }
 0xa24   :  { %2677 = vsyncpa [#allocation6 + $0x1], 1 }
 0xa25   :  { %2678 = vsyncpa [#allocation8], 1 }
 0xa26   :  { %2680 = vsyncpa [#allocation8 + $0x1], 1 }
 0xa27   :  { %2681 = vsyncpa [#allocation11], 1 }
 0xa28   :  { %2683 = vsyncpa [#allocation11 + $0x1], 1 }
 0xa29   :  { %2684 = vsyncpa [#allocation14], 1 }
 0xa2a   :  { %2686 = vsyncpa [#allocation14 + $0x1], 1 }
 0xa2b   :  { %2687 = vsyncpa [#allocation17], 1 }
 0xa2c   :  { %2689 = vsyncpa [#allocation17 + $0x1], 1 }
 0xa2d   :  { %2690 = vsyncpa [#allocation20], 1 }

</bundles_post_ra>
